<compile_context>
chip_gen: v6e
topology: v6e:2x2x1
jax: 0.10.0
libtpu: 0.0.40
codegen_flags: <defaults>
</compile_context>

<pallas_src>
import functools

import jax
import jax.numpy as jnp
import numpy as np
from jax.experimental import pallas as pl
from jax.experimental.pallas import tpu as pltpu


def _round_up(x, m):
    return (x + m - 1) // m * m


def _phase_axis_params(K, s, p, out_size, in_size, q_pad_to=1):
    """Sub-pixel (phase) decomposition parameters for one spatial axis.

    Rewrites   out[q*s + r] = sum_u x_halo[q + u] * W_eff[u, r]
    where x_halo is the original input padded by (pad_lo, pad_hi) and
    W_eff is built from the (flipped) ConvTranspose kernel taps.
    """
    pad_ups = K - 1 - p                                     # pad in upsampled coords
    kh0 = [(pad_ups - r) % s for r in range(s)]             # first kernel tap per phase
    base = [(kh0[r] + r - pad_ups) // s for r in range(s)]  # exact division by construction
    T = [max(0, -(-(K - kh0[r]) // s)) for r in range(s)]   # number of taps per phase
    Q = -(-out_size // s)                                   # output rows per phase
    Qp = _round_up(Q, q_pad_to)
    pad_lo = max(0, -min(base))
    reach = max(base[r] + T[r] - 1 for r in range(s) if T[r] > 0)
    U = reach + pad_lo + 1                                  # union window size
    pad_hi = max(0, (Qp - 1) + (U - 1) - pad_lo - (in_size - 1))
    return dict(kh0=kh0, base=base, T=T, Q=Q, Qp=Qp, U=U,
                pad_lo=pad_lo, pad_hi=pad_hi)


def _build_effective_weight(weight, s, ph, pw, Cout, C2p, dtype):
    """(Cin, Cout, KH, KW) ConvTranspose weight -> (U_h, U_w, Cin, C2p) bank.

    Output channel index is (rh*s + rw)*Cout + co (pixel-shuffle ordering);
    channels >= s*s*Cout are zero padding for lane density.
    """
    Cin, _, KH, KW = weight.shape
    U_h, U_w = ph['U'], pw['U']
    w_eff = jnp.zeros((U_h, U_w, Cin, C2p), jnp.float32)
    for rh in range(s):
        for uh in range(U_h):
            jh = uh - ph['pad_lo'] - ph['base'][rh]
            kh = ph['kh0'][rh] + jh * s
            if jh < 0 or kh >= KH:
                continue
            for rw in range(s):
                for uw in range(U_w):
                    jw = uw - pw['pad_lo'] - pw['base'][rw]
                    kw = pw['kh0'][rw] + jw * s
                    if jw < 0 or kw >= KW:
                        continue
                    c0 = (rh * s + rw) * Cout
                    w_eff = w_eff.at[uh, uw, :, c0:c0 + Cout].set(
                        weight[:, :, KH - 1 - kh, KW - 1 - kw])
    return w_eff.astype(dtype)


def _convt_phase_kernel(x_ref, w_ref, scale_ref, bias_ref, o_ref, *,
                        U_h, U_w, Cin, tQ, Qw, C2p):
    # x_ref     : (1, Hh, Wh, Cin)   halo-padded ORIGINAL-resolution image.
    #             Its block index is constant across the row-tile axis, so it
    #             is DMA'd once per image and re-used by every row tile.
    # w_ref     : (U_h, U_w, Cin, C2p) packed "conv + pixel-shuffle" weights.
    # scale_ref : (1, C2p) folded BatchNorm scale.
    # bias_ref  : (1, C2p) folded BatchNorm bias (+ conv bias).
    # o_ref     : (1, tQ*Qw, C2p)    lane-dense output tile (C2p % 128 == 0).
    t = pl.program_id(1)
    row0 = pl.multiple_of(t * tQ, tQ)

    # Single dynamic load of (tile rows + halo); everything below is static
    # slicing of values — no per-tap dynamic indexing, no output reshape.
    xrows = x_ref[0, pl.ds(row0, tQ + U_h - 1), :, :]          # (tQ+U_h-1, Wh, Cin)

    acc = jnp.zeros((tQ * Qw, C2p), jnp.float32)
    for uw in range(U_w):                                      # W tap: one sublane shift
        cols = xrows[:, uw:uw + Qw, :]                         # (tQ+U_h-1, Qw, Cin)
        for uh in range(U_h):                                  # H tap: free leading slice
            patch = cols[uh:uh + tQ].reshape(tQ * Qw, Cin)     # Qw padded so this is
            acc = acc + jnp.dot(patch, w_ref[uh, uw],          # a layout-preserving fold
                                preferred_element_type=jnp.float32)

    y = acc * scale_ref[...] + bias_ref[...]                   # folded BN affine (f32)
    y = jnp.maximum(y, 0.0)                                    # ReLU
    o_ref[0] = y.astype(o_ref.dtype)


def conv2d_transpose_bn_relu(x_nchw, weight, conv_bias, gamma, beta,
                             running_mean, running_var, *, stride, padding,
                             output_padding=0, eps=1e-5,
                             compute_dtype=jnp.bfloat16):
    """x_nchw: (N, Cin, H, W).  weight: (Cin, Cout, KH, KW) (PyTorch layout)."""
    N, Cin, H, W = x_nchw.shape
    Cin_w, Cout, KH, KW = weight.shape
    assert Cin_w == Cin
    s, p, op = int(stride), int(padding), int(output_padding)

    Hout = (H - 1) * s - 2 * p + KH + op
    Wout = (W - 1) * s - 2 * p + KW + op

    # Pad Qw so the (tQ, Qw, Cin) -> (tQ*Qw, Cin) fold in the kernel is
    # sublane-tile aligned (16 for 16-bit dtypes, 8 for f32).
    qw_align = 16 if jnp.dtype(compute_dtype).itemsize < 4 else 8
    ph = _phase_axis_params(KH, s, p, Hout, H, q_pad_to=1)
    pw = _phase_axis_params(KW, s, p, Wout, W, q_pad_to=qw_align)
    Qh, Qw = ph['Qp'], pw['Qp']
    U_h, U_w = ph['U'], pw['U']
    C2 = s * s * Cout
    C2p = _round_up(C2, 128)                 # lane-dense packed output channels

    # NHWC + small halo pad (original resolution — no zero upsampling).
    x = jnp.transpose(x_nchw, (0, 2, 3, 1))
    x_halo = jnp.pad(x, ((0, 0), (ph['pad_lo'], ph['pad_hi']),
                         (pw['pad_lo'], pw['pad_hi']),
                         (0, 0))).astype(compute_dtype)
    Hh, Wh = x_halo.shape[1], x_halo.shape[2]

    w_eff = _build_effective_weight(weight.astype(jnp.float32), s, ph, pw,
                                    Cout, C2p, compute_dtype)

    # Fold conv bias + BatchNorm (inference mode) into per-channel scale/bias,
    # replicated over the s*s phases and zero-padded to C2p.
    bn_scale = (gamma / jnp.sqrt(running_var + eps)).astype(jnp.float32)
    bn_bias = ((conv_bias - running_mean) * bn_scale + beta).astype(jnp.float32)
    scale2 = jnp.zeros((1, C2p), jnp.float32).at[0, :C2].set(jnp.tile(bn_scale, s * s))
    bias2 = jnp.zeros((1, C2p), jnp.float32).at[0, :C2].set(jnp.tile(bn_bias, s * s))

    # Row tiling: keep the f32 accumulator (tQ*Qw, C2p) around <=16 vregs so it
    # stays in registers (no spills), and give the grid enough steps to pipeline.
    row_budget = max(8, (16 * 1024) // C2p)
    tQ = 1
    for d in range(Qh, 0, -1):
        if Qh % d == 0 and d * Qw <= row_budget:
            tQ = d
            break
    nT = Qh // tQ

    kernel = functools.partial(_convt_phase_kernel, U_h=U_h, U_w=U_w, Cin=Cin,
                               tQ=tQ, Qw=Qw, C2p=C2p)

    out_packed = pl.pallas_call(
        kernel,
        out_shape=jax.ShapeDtypeStruct((N, Qh * Qw, C2p), jnp.float32),
        grid_spec=pltpu.PrefetchScalarGridSpec(
            num_scalar_prefetch=0,
            grid=(N, nT),
            in_specs=[
                # Full (small) halo image; constant in t => DMA'd once per n.
                pl.BlockSpec((1, Hh, Wh, Cin), lambda n, t: (n, 0, 0, 0)),
                pl.BlockSpec((U_h, U_w, Cin, C2p), lambda n, t: (0, 0, 0, 0)),
                pl.BlockSpec((1, C2p), lambda n, t: (0, 0)),
                pl.BlockSpec((1, C2p), lambda n, t: (0, 0)),
            ],
            out_specs=pl.BlockSpec((1, tQ * Qw, C2p), lambda n, t: (n, t, 0)),
        ),
        compiler_params=pltpu.CompilerParams(
            dimension_semantics=("parallel", "parallel")),
    )(x_halo, w_eff, scale2, bias2)

    # Depth-to-space (pixel shuffle) + crop: pure HBM-side layout in plain JAX.
    o = out_packed.reshape(N, Qh, Qw, C2p)[..., :C2]
    o = o.reshape(N, Qh, Qw, s, s, Cout)
    o = jnp.transpose(o, (0, 1, 3, 2, 4, 5)).reshape(N, Qh * s, Qw * s, Cout)
    o = o[:, :Hout, :Wout, :]
    return jnp.transpose(o, (0, 3, 1, 2))                        # back to NCHW


def _reference(x_nchw, weight, conv_bias, gamma, beta, mean, var, *,
               stride, padding, output_padding=0, eps=1e-5, quant_dtype=None):
    """Pure-JAX reference: zero-upsampled input + flipped stride-1 conv."""
    N, Cin, H, W = x_nchw.shape
    _, Cout, KH, KW = weight.shape
    s, p, op = stride, padding, output_padding
    x = jnp.transpose(x_nchw, (0, 2, 3, 1)).astype(jnp.float32)
    w = weight.astype(jnp.float32)
    if quant_dtype is not None:
        x = x.astype(quant_dtype).astype(jnp.float32)
        w = w.astype(quant_dtype).astype(jnp.float32)
    Hup, Wup = (H - 1) * s + 1, (W - 1) * s + 1
    x_up = jnp.zeros((N, Hup, Wup, Cin), jnp.float32).at[:, ::s, ::s, :].set(x)
    x_pad = jnp.pad(x_up, ((0, 0),
                           (KH - 1 - p, KH - 1 - p + op),
                           (KW - 1 - p, KW - 1 - p + op),
                           (0, 0)))
    Hout = (H - 1) * s - 2 * p + KH + op
    Wout = (W - 1) * s - 2 * p + KW + op
    w_k = jnp.transpose(w[:, :, ::-1, ::-1], (2, 3, 0, 1))
    out = jnp.zeros((N, Hout, Wout, Cout), jnp.float32)
    for kh in range(KH):
        for kw in range(KW):
            out = out + jnp.einsum('nhwc,cd->nhwd',
                                   x_pad[:, kh:kh + Hout, kw:kw + Wout, :],
                                   w_k[kh, kw])
    bn_scale = gamma / jnp.sqrt(var + eps)
    out = out * bn_scale + (conv_bias - mean) * bn_scale + beta
    out = jnp.maximum(out, 0.0)
    return jnp.transpose(out, (0, 3, 1, 2))


def _run_case(key, *, N, Cin, H, W, Cout, KH, KW, stride, padding, output_padding):
    kx, kw, kb, kg, kbt, km, kv = jax.random.split(key, 7)
    x = jax.random.normal(kx, (N, Cin, H, W), dtype=jnp.float32)
    weight = jax.random.normal(kw, (Cin, Cout, KH, KW), dtype=jnp.float32) * 0.1
    conv_bias = jax.random.normal(kb, (Cout,), dtype=jnp.float32) * 0.1
    gamma = 1.0 + 0.1 * jax.random.normal(kg, (Cout,), dtype=jnp.float32)
    beta = 0.1 * jax.random.normal(kbt, (Cout,), dtype=jnp.float32)
    rmean = 0.1 * jax.random.normal(km, (Cout,), dtype=jnp.float32)
    rvar = jnp.abs(jax.random.normal(kv, (Cout,), dtype=jnp.float32)) + 0.5

    fwd = jax.jit(functools.partial(
        conv2d_transpose_bn_relu, stride=stride, padding=padding,
        output_padding=output_padding, compute_dtype=jnp.bfloat16))
    out = jax.block_until_ready(fwd(x, weight, conv_bias, gamma, beta, rmean, rvar))

    ref = _reference(x, weight, conv_bias, gamma, beta, rmean, rvar,
                     stride=stride, padding=padding,
                     output_padding=output_padding, quant_dtype=jnp.bfloat16)
    Hout = (H - 1) * stride - 2 * padding + KH + output_padding
    Wout = (W - 1) * stride - 2 * padding + KW + output_padding
    assert out.shape == (N, Cout, Hout, Wout), out.shape
    np.testing.assert_allclose(np.asarray(out), np.asarray(ref),
                               rtol=2e-3, atol=2e-3)


if __name__ == "__main__":
    k0, k1 = jax.random.split(jax.random.PRNGKey(0))
    # Primary small config: cin=4, cout=8, k=4, stride=2, padding=1.
    _run_case(k0, N=2, Cin=4, H=16, W=16, Cout=8,
              KH=4, KW=4, stride=2, padding=1, output_padding=0)
    # Non-square kernel + output_padding + odd spatial size (exercises the
    # per-axis halo math fixed per the review, and Qw lane/sublane padding).
    _run_case(k1, N=2, Cin=4, H=7, W=7, Cout=8,
              KH=3, KW=5, stride=2, padding=1, output_padding=1)
    print("KERNEL_OK")
</pallas_src>

<mosaic_0001>
module attributes {stable_mosaic.version = 11 : i64} {
  func.func @_convt_phase_kernel(%arg0: i32, %arg1: i32, %arg2: memref<1x18x18x4xbf16, #tpu.memory_space<vmem>>, %arg3: memref<3x3x4x128xbf16, #tpu.memory_space<vmem>>, %arg4: memref<1x128xf32, #tpu.memory_space<vmem>>, %arg5: memref<1x128xf32, #tpu.memory_space<vmem>>, %arg6: memref<1x128x128xf32, #tpu.memory_space<vmem>>) attributes {dimension_semantics = [#tpu.dimension_semantics<parallel>, #tpu.dimension_semantics<parallel>], iteration_bounds = array<i64: 2, 2>, scalar_prefetch = 0 : i64, scratch_operands = 0 : i64, tpu.core_type = #tpu.core_type<tc>, window_params = [{transform_indices = @transform_0, window_bounds = array<i64: 1, 18, 18, 4>}, {pipeline_mode = #tpu.pipeline_mode<synchronous>, transform_indices = @transform_1, window_bounds = array<i64: 3, 3, 4, 128>}, {pipeline_mode = #tpu.pipeline_mode<synchronous>, transform_indices = @transform_2, window_bounds = array<i64: 1, 128>}, {pipeline_mode = #tpu.pipeline_mode<synchronous>, transform_indices = @transform_3, window_bounds = array<i64: 1, 128>}, {transform_indices = @transform_4, window_bounds = array<i64: 1, 128, 128>}]} {
    %c8_i32 = arith.constant 8 : i32
    %0 = arith.muli %arg1, %c8_i32 : i32
    %1 = tpu.assume_multiple %0, 8 : i32
    %c0 = arith.constant 0 : index
    %2 = arith.index_cast %1 : i32 to index
    %c0_0 = arith.constant 0 : index
    %c0_1 = arith.constant 0 : index
    %3 = vector.load %arg2[%c0, %2, %c0_0, %c0_1] : memref<1x18x18x4xbf16, #tpu.memory_space<vmem>>, vector<1x10x18x4xbf16>
    %4 = vector.shape_cast %3 : vector<1x10x18x4xbf16> to vector<10x18x4xbf16>
    %cst = arith.constant 0.000000e+00 : f32
    %5 = vector.broadcast %cst : f32 to vector<128x128xf32>
    %6 = vector.extract_strided_slice %4 {offsets = [0, 0, 0], sizes = [10, 16, 4], strides = [1, 1, 1]} : vector<10x18x4xbf16> to vector<10x16x4xbf16>
    %7 = vector.extract_strided_slice %6 {offsets = [0, 0, 0], sizes = [8, 16, 4], strides = [1, 1, 1]} : vector<10x16x4xbf16> to vector<8x16x4xbf16>
    %8 = vector.shape_cast %7 : vector<8x16x4xbf16> to vector<128x4xbf16>
    %c0_2 = arith.constant 0 : index
    %c0_3 = arith.constant 0 : index
    %c0_4 = arith.constant 0 : index
    %c0_5 = arith.constant 0 : index
    %9 = vector.load %arg3[%c0_2, %c0_3, %c0_4, %c0_5] : memref<3x3x4x128xbf16, #tpu.memory_space<vmem>>, vector<1x1x4x128xbf16>
    %10 = vector.shape_cast %9 : vector<1x1x4x128xbf16> to vector<4x128xbf16>
    %cst_6 = arith.constant dense<0.000000e+00> : vector<128x128xf32>
    %11 = tpu.matmul %8, %10, %cst_6 {dimension_numbers = #tpu.dot_dimension_numbers<[1], [0], [0], [1], [0, 0, 1, 1], [], []>} : vector<128x4xbf16>, vector<4x128xbf16>, vector<128x128xf32> -> vector<128x128xf32>
    %12 = arith.addf %5, %11 : vector<128x128xf32>
    %13 = vector.extract_strided_slice %6 {offsets = [1, 0, 0], sizes = [8, 16, 4], strides = [1, 1, 1]} : vector<10x16x4xbf16> to vector<8x16x4xbf16>
    %14 = vector.shape_cast %13 : vector<8x16x4xbf16> to vector<128x4xbf16>
    %c1 = arith.constant 1 : index
    %c0_7 = arith.constant 0 : index
    %c0_8 = arith.constant 0 : index
    %c0_9 = arith.constant 0 : index
    %15 = vector.load %arg3[%c1, %c0_7, %c0_8, %c0_9] : memref<3x3x4x128xbf16, #tpu.memory_space<vmem>>, vector<1x1x4x128xbf16>
    %16 = vector.shape_cast %15 : vector<1x1x4x128xbf16> to vector<4x128xbf16>
    %cst_10 = arith.constant dense<0.000000e+00> : vector<128x128xf32>
    %17 = tpu.matmul %14, %16, %cst_10 {dimension_numbers = #tpu.dot_dimension_numbers<[1], [0], [0], [1], [0, 0, 1, 1], [], []>} : vector<128x4xbf16>, vector<4x128xbf16>, vector<128x128xf32> -> vector<128x128xf32>
    %18 = arith.addf %12, %17 : vector<128x128xf32>
    %19 = vector.extract_strided_slice %6 {offsets = [2, 0, 0], sizes = [8, 16, 4], strides = [1, 1, 1]} : vector<10x16x4xbf16> to vector<8x16x4xbf16>
    %20 = vector.shape_cast %19 : vector<8x16x4xbf16> to vector<128x4xbf16>
    %c2 = arith.constant 2 : index
    %c0_11 = arith.constant 0 : index
    %c0_12 = arith.constant 0 : index
    %c0_13 = arith.constant 0 : index
    %21 = vector.load %arg3[%c2, %c0_11, %c0_12, %c0_13] : memref<3x3x4x128xbf16, #tpu.memory_space<vmem>>, vector<1x1x4x128xbf16>
    %22 = vector.shape_cast %21 : vector<1x1x4x128xbf16> to vector<4x128xbf16>
    %cst_14 = arith.constant dense<0.000000e+00> : vector<128x128xf32>
    %23 = tpu.matmul %20, %22, %cst_14 {dimension_numbers = #tpu.dot_dimension_numbers<[1], [0], [0], [1], [0, 0, 1, 1], [], []>} : vector<128x4xbf16>, vector<4x128xbf16>, vector<128x128xf32> -> vector<128x128xf32>
    %24 = arith.addf %18, %23 : vector<128x128xf32>
    %25 = vector.extract_strided_slice %4 {offsets = [0, 1, 0], sizes = [10, 16, 4], strides = [1, 1, 1]} : vector<10x18x4xbf16> to vector<10x16x4xbf16>
    %26 = vector.extract_strided_slice %25 {offsets = [0, 0, 0], sizes = [8, 16, 4], strides = [1, 1, 1]} : vector<10x16x4xbf16> to vector<8x16x4xbf16>
    %27 = vector.shape_cast %26 : vector<8x16x4xbf16> to vector<128x4xbf16>
    %c0_15 = arith.constant 0 : index
    %c1_16 = arith.constant 1 : index
    %c0_17 = arith.constant 0 : index
    %c0_18 = arith.constant 0 : index
    %28 = vector.load %arg3[%c0_15, %c1_16, %c0_17, %c0_18] : memref<3x3x4x128xbf16, #tpu.memory_space<vmem>>, vector<1x1x4x128xbf16>
    %29 = vector.shape_cast %28 : vector<1x1x4x128xbf16> to vector<4x128xbf16>
    %cst_19 = arith.constant dense<0.000000e+00> : vector<128x128xf32>
    %30 = tpu.matmul %27, %29, %cst_19 {dimension_numbers = #tpu.dot_dimension_numbers<[1], [0], [0], [1], [0, 0, 1, 1], [], []>} : vector<128x4xbf16>, vector<4x128xbf16>, vector<128x128xf32> -> vector<128x128xf32>
    %31 = arith.addf %24, %30 : vector<128x128xf32>
    %32 = vector.extract_strided_slice %25 {offsets = [1, 0, 0], sizes = [8, 16, 4], strides = [1, 1, 1]} : vector<10x16x4xbf16> to vector<8x16x4xbf16>
    %33 = vector.shape_cast %32 : vector<8x16x4xbf16> to vector<128x4xbf16>
    %c1_20 = arith.constant 1 : index
    %c1_21 = arith.constant 1 : index
    %c0_22 = arith.constant 0 : index
    %c0_23 = arith.constant 0 : index
    %34 = vector.load %arg3[%c1_20, %c1_21, %c0_22, %c0_23] : memref<3x3x4x128xbf16, #tpu.memory_space<vmem>>, vector<1x1x4x128xbf16>
    %35 = vector.shape_cast %34 : vector<1x1x4x128xbf16> to vector<4x128xbf16>
    %cst_24 = arith.constant dense<0.000000e+00> : vector<128x128xf32>
    %36 = tpu.matmul %33, %35, %cst_24 {dimension_numbers = #tpu.dot_dimension_numbers<[1], [0], [0], [1], [0, 0, 1, 1], [], []>} : vector<128x4xbf16>, vector<4x128xbf16>, vector<128x128xf32> -> vector<128x128xf32>
    %37 = arith.addf %31, %36 : vector<128x128xf32>
    %38 = vector.extract_strided_slice %25 {offsets = [2, 0, 0], sizes = [8, 16, 4], strides = [1, 1, 1]} : vector<10x16x4xbf16> to vector<8x16x4xbf16>
    %39 = vector.shape_cast %38 : vector<8x16x4xbf16> to vector<128x4xbf16>
    %c2_25 = arith.constant 2 : index
    %c1_26 = arith.constant 1 : index
    %c0_27 = arith.constant 0 : index
    %c0_28 = arith.constant 0 : index
    %40 = vector.load %arg3[%c2_25, %c1_26, %c0_27, %c0_28] : memref<3x3x4x128xbf16, #tpu.memory_space<vmem>>, vector<1x1x4x128xbf16>
    %41 = vector.shape_cast %40 : vector<1x1x4x128xbf16> to vector<4x128xbf16>
    %cst_29 = arith.constant dense<0.000000e+00> : vector<128x128xf32>
    %42 = tpu.matmul %39, %41, %cst_29 {dimension_numbers = #tpu.dot_dimension_numbers<[1], [0], [0], [1], [0, 0, 1, 1], [], []>} : vector<128x4xbf16>, vector<4x128xbf16>, vector<128x128xf32> -> vector<128x128xf32>
    %43 = arith.addf %37, %42 : vector<128x128xf32>
    %44 = vector.extract_strided_slice %4 {offsets = [0, 2, 0], sizes = [10, 16, 4], strides = [1, 1, 1]} : vector<10x18x4xbf16> to vector<10x16x4xbf16>
    %45 = vector.extract_strided_slice %44 {offsets = [0, 0, 0], sizes = [8, 16, 4], strides = [1, 1, 1]} : vector<10x16x4xbf16> to vector<8x16x4xbf16>
    %46 = vector.shape_cast %45 : vector<8x16x4xbf16> to vector<128x4xbf16>
    %c0_30 = arith.constant 0 : index
    %c2_31 = arith.constant 2 : index
    %c0_32 = arith.constant 0 : index
    %c0_33 = arith.constant 0 : index
    %47 = vector.load %arg3[%c0_30, %c2_31, %c0_32, %c0_33] : memref<3x3x4x128xbf16, #tpu.memory_space<vmem>>, vector<1x1x4x128xbf16>
    %48 = vector.shape_cast %47 : vector<1x1x4x128xbf16> to vector<4x128xbf16>
    %cst_34 = arith.constant dense<0.000000e+00> : vector<128x128xf32>
    %49 = tpu.matmul %46, %48, %cst_34 {dimension_numbers = #tpu.dot_dimension_numbers<[1], [0], [0], [1], [0, 0, 1, 1], [], []>} : vector<128x4xbf16>, vector<4x128xbf16>, vector<128x128xf32> -> vector<128x128xf32>
    %50 = arith.addf %43, %49 : vector<128x128xf32>
    %51 = vector.extract_strided_slice %44 {offsets = [1, 0, 0], sizes = [8, 16, 4], strides = [1, 1, 1]} : vector<10x16x4xbf16> to vector<8x16x4xbf16>
    %52 = vector.shape_cast %51 : vector<8x16x4xbf16> to vector<128x4xbf16>
    %c1_35 = arith.constant 1 : index
    %c2_36 = arith.constant 2 : index
    %c0_37 = arith.constant 0 : index
    %c0_38 = arith.constant 0 : index
    %53 = vector.load %arg3[%c1_35, %c2_36, %c0_37, %c0_38] : memref<3x3x4x128xbf16, #tpu.memory_space<vmem>>, vector<1x1x4x128xbf16>
    %54 = vector.shape_cast %53 : vector<1x1x4x128xbf16> to vector<4x128xbf16>
    %cst_39 = arith.constant dense<0.000000e+00> : vector<128x128xf32>
    %55 = tpu.matmul %52, %54, %cst_39 {dimension_numbers = #tpu.dot_dimension_numbers<[1], [0], [0], [1], [0, 0, 1, 1], [], []>} : vector<128x4xbf16>, vector<4x128xbf16>, vector<128x128xf32> -> vector<128x128xf32>
    %56 = arith.addf %50, %55 : vector<128x128xf32>
    %57 = vector.extract_strided_slice %44 {offsets = [2, 0, 0], sizes = [8, 16, 4], strides = [1, 1, 1]} : vector<10x16x4xbf16> to vector<8x16x4xbf16>
    %58 = vector.shape_cast %57 : vector<8x16x4xbf16> to vector<128x4xbf16>
    %c2_40 = arith.constant 2 : index
    %c2_41 = arith.constant 2 : index
    %c0_42 = arith.constant 0 : index
    %c0_43 = arith.constant 0 : index
    %59 = vector.load %arg3[%c2_40, %c2_41, %c0_42, %c0_43] : memref<3x3x4x128xbf16, #tpu.memory_space<vmem>>, vector<1x1x4x128xbf16>
    %60 = vector.shape_cast %59 : vector<1x1x4x128xbf16> to vector<4x128xbf16>
    %cst_44 = arith.constant dense<0.000000e+00> : vector<128x128xf32>
    %61 = tpu.matmul %58, %60, %cst_44 {dimension_numbers = #tpu.dot_dimension_numbers<[1], [0], [0], [1], [0, 0, 1, 1], [], []>} : vector<128x4xbf16>, vector<4x128xbf16>, vector<128x128xf32> -> vector<128x128xf32>
    %62 = arith.addf %56, %61 : vector<128x128xf32>
    %c0_45 = arith.constant 0 : index
    %c0_46 = arith.constant 0 : index
    %63 = vector.load %arg4[%c0_45, %c0_46] : memref<1x128xf32, #tpu.memory_space<vmem>>, vector<1x128xf32>
    %64 = vector.broadcast %63 : vector<1x128xf32> to vector<128x128xf32>
    %65 = arith.mulf %62, %64 : vector<128x128xf32>
    %c0_47 = arith.constant 0 : index
    %c0_48 = arith.constant 0 : index
    %66 = vector.load %arg5[%c0_47, %c0_48] : memref<1x128xf32, #tpu.memory_space<vmem>>, vector<1x128xf32>
    %67 = vector.broadcast %66 : vector<1x128xf32> to vector<128x128xf32>
    %68 = arith.addf %65, %67 : vector<128x128xf32>
    %cst_49 = arith.constant 0.000000e+00 : f32
    %69 = vector.broadcast %cst_49 : f32 to vector<128x128xf32>
    %70 = arith.maximumf %68, %69 : vector<128x128xf32>
    %c0_50 = arith.constant 0 : index
    %c0_51 = arith.constant 0 : index
    %c0_52 = arith.constant 0 : index
    %71 = vector.load %arg6[%c0_50, %c0_51, %c0_52] : memref<1x128x128xf32, #tpu.memory_space<vmem>>, vector<1x128x128xf32>
    %72 = vector.shape_cast %71 : vector<1x128x128xf32> to vector<128x128xf32>
    %73 = vector.shape_cast %70 : vector<128x128xf32> to vector<1x128x128xf32>
    tpu.vector_store %arg6[%c0_50, %c0_51, %c0_52], %73 {strides = array<i32>} : memref<1x128x128xf32, #tpu.memory_space<vmem>>, vector<1x128x128xf32>,
    return
  }
  func.func @transform_0(%arg0: i32, %arg1: i32) -> (i32, i32, i32, i32) {
    %c0_i32 = arith.constant 0 : i32
    %c0_i32_0 = arith.constant 0 : i32
    %c0_i32_1 = arith.constant 0 : i32
    %c0_i32_2 = arith.constant 0 : i32
    return %arg0, %c0_i32, %c0_i32_0, %c0_i32_1 : i32, i32, i32, i32
  }
  func.func @transform_1(%arg0: i32, %arg1: i32) -> (i32, i32, i32, i32) {
    %c0_i32 = arith.constant 0 : i32
    %c0_i32_0 = arith.constant 0 : i32
    %c0_i32_1 = arith.constant 0 : i32
    %c0_i32_2 = arith.constant 0 : i32
    %c0_i32_3 = arith.constant 0 : i32
    return %c0_i32, %c0_i32_0, %c0_i32_1, %c0_i32_2 : i32, i32, i32, i32
  }
  func.func @transform_2(%arg0: i32, %arg1: i32) -> (i32, i32) {
    %c0_i32 = arith.constant 0 : i32
    %c0_i32_0 = arith.constant 0 : i32
    %c0_i32_1 = arith.constant 0 : i32
    return %c0_i32, %c0_i32_0 : i32, i32
  }
  func.func @transform_3(%arg0: i32, %arg1: i32) -> (i32, i32) {
    %c0_i32 = arith.constant 0 : i32
    %c0_i32_0 = arith.constant 0 : i32
    %c0_i32_1 = arith.constant 0 : i32
    return %c0_i32, %c0_i32_0 : i32, i32
  }
  func.func @transform_4(%arg0: i32, %arg1: i32) -> (i32, i32, i32) {
    %c0_i32 = arith.constant 0 : i32
    %c0_i32_0 = arith.constant 0 : i32
    return %arg0, %arg1, %c0_i32 : i32, i32, i32
  }
}

</mosaic_0001>

<bundles_post_ra>
// kernel: conv2d_transpose_bn_relu.1
= control target key start
LH: loop header
LB: loop body
LE: loop exit
PB: predicated region body
PF: predicated region fallthrough
CT: control target
= control target key end

     0   :  { %s2485_s15 = smov 0   ;;  %s2487_s16 = smov 0   ;;  %s3471_s0 = inlined_call_operand.vmem [shape: bf16[2,18,18,4], index: 0, kind: input, shape index: {}]   ;;  %s3472_s1 = inlined_call_operand.vmem [shape: bf16[3,3,4,128], index: 1, kind: input, shape index: {}]   ;;  %s3473_s2 = inlined_call_operand.vmem [shape: f32[1,128], index: 2, kind: input, shape index: {}]   ;;  %s3474_s3 = inlined_call_operand.vmem [shape: f32[1,128], index: 3, kind: input, shape index: {}]   ;;  %s3475_s4 = inlined_call_operand.vmem [shape: f32[2,256,128], index: 4, kind: output, shape index: {}]  }
   0x1   :  { %s2489_s17 = smov 0   ;;  %s2491_s18 = smov 0  }
   0x2   :  { %s2493_s19 = smov 0  }
   0x3 LB: > { %s23_s20 = sadd.s32 1, %s2450_s17  ;;  %s26_s21 = sadd.s32 1, %s2454_s18  ;;  %s2458_s19 = sphi %s2493_s19, %s14_s19   ;;  %s2454_s18 = sphi %s2491_s18, %s3558_s18   ;;  %s2450_s17 = sphi %s2489_s17, %s3557_s17   ;;  %s2446_s16 = sphi %s2487_s16, %s3556_s16   ;;  %s2442_s15 = sphi %s2485_s15, %s3555_s15  }
   0x4   : > { %p24_p0 = scmp.ge.s32.totalorder %s23_s20, 2  ;;  %p1981_p1 = scmp.ge.s32.totalorder %s2458_s19, 1 }
   0x5   : > { %p176_p2 = scmp.lt.s32.totalorder %s2458_s19, 5 }
   0x6   : > { %s3560_s20 = smov (%p24_p0, %s23_s20), 0  ;;  %s3562_s21 = smov (!%p24_p0, %s26_s21), %s2454_s18 }
   0x7   : > { %p177_p3 = pnand %p1981_p1, %p176_p2  ;;  %p28_p4 = scmp.ge.s32.totalorder %s3562_s21, 2 }
   0x9   : > { %s3564_s21 = smov (%p28_p4, %s3562_s21), 0  ;;  %180 = sbr.rel (%p177_p3) target bundleno = 375 (0x177), region = 36 }
   0xe   : > { %v1989_v0 = vld [vmem:[%s3472_s1 + $0x6] sm:$0x3]  ;;  %vm324_vm0 = vcmask 1041408   ;;  %p206_p5 = scmp.lt.s32.totalorder %s2446_s16, 1  ;;  %v256_v2 = vld [vmem:[%s3472_s1] sm:$0x3] }
   0xf   : > { %2360 = vmatprep.subr.msk.bf16.mxu1 %vm324_vm0, %v1989_v0  ;;  %2359 = vmatprep.subr.msk.bf16.mxu0 %vm324_vm0, %v1989_v0  ;;  %v326_v1 = vsel %vm324_vm0, %v1989_v0, 0  ;;  %v2015_v3 = vld [vmem:[%s3472_s1 + $0xc] sm:$0x3]  ;;  %s2113_s28 = smul.u32 96, %s2442_s15  ;;  %vm1324_vm1 = vcmask 1042432   ;;  %vm1325_vm2 = vcmask 1046532  }
  0x10   : > { %2358 = vmatpush3.bf16.msra.mxu1 %v326_v1  ;;  %2196 = vmatpush3.bf16.msra.mxu0 %v326_v1  ;;  %s3566_s16 = smov (!%p206_p5, %s2446_s16), 1  ;;  %vm299_vm3 = vcmask 31744   ;;  %vm2550_vm4 = vmor %vm1324_vm1, %vm1325_vm2  ;;  %v2025_v15 = vld [vmem:[%s3472_s1 + $0x2] sm:$0x3]  ;;  %v2042_v16 = vld [vmem:[%s3472_s1 + $0x8] sm:$0x3] }
  0x11   : > { %2361 = vmatprep.subr.msk.bf16.mxu1 %vm324_vm0, %v256_v2  ;;  %2362 = vmatprep.subr.msk.bf16.mxu0 %vm324_vm0, %v2015_v3  ;;  %s2369_s29 = smul.u32 216, %s3566_s16  ;;  %v434_v22 = vsel %vm324_vm0, %v256_v2, 0  ;;  %v544_v25 = vsel %vm324_vm0, %v2015_v3, 0  ;;  %v2595_v26 = vsel %vm324_vm0, %v2025_v15, 0  ;;  %v2602_v30 = vsel %vm324_vm0, %v2042_v16, 0  ;;  %s1983_s27 = sshll.u32 %s2442_s15, 4 }
  0x12   : > { %v2634_v43 = vld [vmem:[%s3472_s1 + $0xe] sm:$0x3]  ;;  %v2651_v48 = vld [vmem:[%s3472_s1 + $0x4] sm:$0x3]  ;;  %vm659_vm5 = vsmask.f32 3328 }
  0x13   : > { %s210_s6 = scalar_lea.vmem %s3471_s0, %s2369_s29  ;;  %v2685_v63 = vsel %vm324_vm0, %v2634_v43, 0  ;;  %v2689_v0 = vsel %vm324_vm0, %v2651_v48, 0  ;;  %vm660_vm6 = vsmask.f32 7440  ;;  %p214_p6 = scmp.lt.s32.totalorder %s1983_s27, 31 }
  0x14   : > { %s2538_s7 = scalar_lea.vmem %s210_s6, %s2113_s28  ;;  %3489 = vst [vmem:[#allocation6_spill] sm:$0xff] %v2685_v63  ;;  %3490 = vst [vmem:[#allocation7_spill] sm:$0xff] %v2689_v0  ;;  %s1984_s15 = sshll.u32 %s3566_s16, 5 }
  0x15   : > { %v229_v4 = vld [vmem:[%s2538_s7 + $0xc] sm:$0xf]  ;;  %v2542_v5 = vld [vmem:[%s2538_s7 + $0x10] sm:$0xf]  ;;  %v2545_v6 = vld [vmem:[%s2538_s7 + $0x3c] sm:$0xf] }
  0x16   : > { %3483 = vst [vmem:[#allocation2_spill] sm:$0xff] %v2545_v6  ;;  %v2548_v7 = vcombine.low %v229_v4, %v2542_v5  ;;  %v2555_v9 = vld [vmem:[%s2538_s7 + $0x40] sm:$0xf]  ;;  %v2063_v10 = vrot.slane %v229_v4, 9  ;;  %v1336_v11 = vrot.slane %v2542_v5, 5  ;;  %v687_v13 = vshrl.u32 %v229_v4, 16  ;;  %vm2807_vm7 = vmor %vm659_vm5, %vm660_vm6 }
  0x17   : > { %3486 = vst [vmem:[#allocation3_spill] sm:$0xff] %v2555_v9  ;;  %v2560_v12 = vcombine.low %v2545_v6, %v2555_v9  ;;  %v690_v14 = vshll.u32 %v229_v4, 16  ;;  %v696_v17 = vshll.u32 %v2542_v5, 16  ;;  %v700_v18 = vshrl.u32 %v2542_v5, 16  ;;  %v2581_v20 = vld [vmem:[%s2538_s7 + $0x18] sm:$0xf] }
  0x18   : > { %2197 = vmatprep.mubr.msk.bf16.mxu0 %vm299_vm3, %v2548_v7  ;;  %v2576_v19 = vsel %vm2550_vm4, %v2063_v10, %v1336_v11  ;;  %v2584_v21 = vld [vmem:[%s2538_s7 + $0x1c] sm:$0xf]  ;;  %v2588_v23 = vld [vmem:[%s2538_s7 + $0x48] sm:$0xf]  ;;  %v2591_v24 = vld [vmem:[%s2538_s7 + $0x4c] sm:$0xf] }
  0x19   : > { %2205 = vmatprep.mubr.msk.bf16.mxu1 %vm299_vm3, %v2560_v12  ;;  %v689_v27 = vrot.slane %v687_v13, 4  ;;  %v692_v28 = vrot.slane %v690_v14, 5  ;;  %v2599_v29 = vcombine.low %v2581_v20, %v2584_v21  ;;  %v2604_v31 = vrot.slane %v696_v17, 5  ;;  %v2607_v33 = vld [vmem:[%s2538_s7 + $0x24] sm:$0xf]  ;;  %s3568_s27 = smov (!%p214_p6, %s1983_s27), 31 }
  0x1a   : > { %v702_v32 = vrot.slane %v700_v18, 4  ;;  %v2610_v34 = vld [vmem:[%s2538_s7 + $0x28] sm:$0xf]  ;;  %v711_v35 = vshrl.u32 %v2581_v20, 16  ;;  %v714_v36 = vshll.u32 %v2581_v20, 16  ;;  %v2618_v37 = vcombine.low %v2588_v23, %v2591_v24  ;;  %s3345_s16 = sadd.s32 %s1984_s15, %s3568_s27 }
  0x1b   : > { %2198 = vmatmul.mubr.msk.bf16.vlgmr.msra.gmra.mxu0 %vm299_vm3, %v2599_v29  ;;  %v2621_v38 = vld [vmem:[%s2538_s7 + $0x54] sm:$0xf]  ;;  %v2624_v39 = vld [vmem:[%s2538_s7 + $0x58] sm:$0xf]  ;;  %v720_v40 = vshll.u32 %v2584_v21, 16  ;;  %v724_v41 = vshrl.u32 %v2584_v21, 16  ;;  %v2642_v46 = vcombine.low %v2607_v33, %v2610_v34  ;;  %v693_v49 = vor.u32 %v692_v28, %v689_v27 }
  0x1c   : > { %2232 = vmatpush3.bf16.msra.mxu0 %v544_v25  ;;  %v2629_v42 = vld [vmem:[%s2538_s7 + $0x30] sm:$0xf]  ;;  %v783_v44 = vshrl.u32 %v2545_v6, 16  ;;  %v786_v45 = vshll.u32 %v2545_v6, 16  ;;  %2206 = vmatmul.mubr.msk.bf16.vlgmr.msra.gmra.mxu1 %vm299_vm3, %v2618_v37  ;;  %v2645_v47 = vld [vmem:[%s2538_s7 + $0x34] sm:$0xf]  ;;  %v2657_v52 = vcombine.low %v2621_v38, %v2624_v39  ;;  %v703_v55 = vor.u32 %v702_v32, %v2604_v31 }
  0x1d   : > { %2364 = vmatprep.subr.msk.bf16.mxu0 %vm324_vm0, %v2042_v16  ;;  %v792_v50 = vshll.u32 %v2555_v9, 16  ;;  %v796_v51 = vshrl.u32 %v2555_v9, 16  ;;  %2214 = vmatpush3.bf16.msra.mxu1 %v434_v22  ;;  %v2660_v53 = vld [vmem:[%s2538_s7 + $0x60] sm:$0xf]  ;;  %v2663_v54 = vld [vmem:[%s2538_s7 + $0x64] sm:$0xf]  ;;  %v2670_v58 = vcombine.low %v2629_v42, %v2645_v47 }
  0x1e   : > { %v713_v56 = vrot.slane %v711_v35, 4  ;;  %v716_v57 = vrot.slane %v714_v36, 5  ;;  %2201 = vmatprep.mubr.msk.bf16.mxu0 %vm299_vm3, %v2642_v46  ;;  %v2673_v59 = vld [vmem:[%s2538_s7] sm:$0xf]  ;;  %v2676_v60 = vld [vmem:[%s2538_s7 + $0x4] sm:$0xf]  ;;  %2363 = vmatprep.subr.msk.bf16.mxu1 %vm324_vm0, %v2025_v15  ;;  %v2701_v4 = vcombine.low %v2660_v53, %v2663_v54 }
  0x1f   : > { %3487 = vst [vmem:[#allocation4_spill] sm:$0xff] %v2673_v59  ;;  %3488 = vst [vmem:[#allocation5_spill] sm:$0xff] %v2676_v60  ;;  %v2679_v61 = vrot.slane %v720_v40, 5  ;;  %v726_v62 = vrot.slane %v724_v41, 4  ;;  %2209 = vmatprep.mubr.msk.bf16.mxu1 %vm299_vm3, %v2657_v52  ;;  %v2693_v1 = vrot.slane %v1336_v11, 4  ;;  %v2695_v2 = vrot.slane %v783_v44, 4 }
  0x20   : > { %v2697_v3 = vrot.slane %v786_v45, 5  ;;  %v2703_v10 = vrot.slane %v693_v49, 4  ;;  %v2006_v15 = vcombine.low %v2673_v59, %v2676_v60  ;;  %v2709_v5 = vrot.slane %v703_v55, 4  ;;  %v2753_v27 = vld [vmem:[%s2538_s7 + $0x20] sm:$0x1]  ;;  %s1985_s6 = sshll.u32 %s3345_s16, 3 }
  0x21   : > { %v2711_v11 = vrot.slane %v792_v50, 5  ;;  %v2713_v16 = vrot.slane %v796_v51, 4  ;;  %v717_v17 = vor.u32 %v716_v57, %v713_v56  ;;  %v727_v18 = vor.u32 %v726_v62, %v2679_v61  ;;  %v2748_v50 = vld [vmem:[%s2538_s7 + $0x14] sm:$0x1]  ;;  %v2782_v63 = vld [vmem:[%s2538_s7 + $0x44] sm:$0x1]  ;;  %s3382_s9 = scalar_lea.vmem %s3475_s4, %s1985_s6 }
  0x22   : > { %v735_v28 = vshrl.u32 %v2607_v33, 16  ;;  %v738_v32 = vshll.u32 %v2607_v33, 16  ;;  %v663_v35 = vshrl.u32 %v2673_v59, 16  ;;  %v666_v36 = vshll.u32 %v2673_v59, 16  ;;  %v2759_v59 = vld [vmem:[%s2538_s7 + $0x6c] sm:$0xf] }
  0x23   : > { %2202 = vmatmul.mubr.msk.bf16.gmra.mxu0 %vm299_vm3, %v2670_v58  ;;  %v748_v40 = vshrl.u32 %v2610_v34, 16  ;;  %v676_v44 = vshrl.u32 %v2676_v60, 16  ;;  %v672_v45 = vshll.u32 %v2676_v60, 16  ;;  %v2734_v49 = vrot.slane %v717_v17, 4  ;;  %v2745_v17 = vld [vmem:[%s2538_s7 + $0x8] sm:$0x1] }
  0x24   : > { %2233 = vmatprep.mubr.msk.bf16.mxu0 %vm299_vm3, %v2599_v29  ;;  %2210 = vmatmul.mubr.msk.bf16.gmra.mxu1 %vm299_vm3, %v2701_v4  ;;  %v759_v55 = vshrl.u32 %v2629_v42, 16  ;;  %v2739_v56 = vrot.slane %v727_v18, 4  ;;  %v762_v57 = vshll.u32 %v2629_v42, 16  ;;  %v772_v62 = vshrl.u32 %v2645_v47, 16  ;;  %3491 = vst [vmem:[#allocation8_spill] sm:$0xff] %v2745_v17  ;;  %3492 = vst [vmem:[#allocation9_spill] sm:$0xff] %v2782_v63 }
  0x25   : > { %2215 = vmatprep.mubr.msk.bf16.mxu1 %vm299_vm3, %v2006_v15  ;;  %v744_v15 = vshll.u32 %v2610_v34, 16  ;;  %v665_v13 = vrot.slane %v663_v35, 4  ;;  %v668_v14 = vrot.slane %v666_v36, 5  ;;  %v2750_v51 = vrot.slane %v672_v45, 5  ;;  %v2762_v60 = vld [vmem:[%s2538_s7 + $0x2c] sm:$0x1] }
  0x26   : > { %v678_v41 = vrot.slane %v676_v44, 4  ;;  %v737_v18 = vrot.slane %v735_v28, 4  ;;  %v740_v25 = vrot.slane %v738_v32, 5  ;;  %v750_v36 = vrot.slane %v748_v40, 4  ;;  %v2772_v28 = vld [vmem:[%s2538_s7 + $0x70] sm:$0xf] }
  0x27   : > { %v2764_v35 = vrot.slane %v744_v15, 5  ;;  %v761_v45 = vrot.slane %v759_v55, 4  ;;  %v682_v32 = vshll.u32 %v2745_v17, 16  ;;  %v764_v22 = vrot.slane %v762_v57, 5  ;;  %v2791_v44 = vld [vmem:[%s2538_s7 + $0x38] sm:$0x1] }
  0x28   : > { %v669_v40 = vor.u32 %v668_v14, %v665_v13  ;;  %v706_v55 = vshll.u32 %v2748_v50, 16  ;;  %v774_v15 = vrot.slane %v772_v62, 4  ;;  %v679_v57 = vor.u32 %v678_v41, %v2750_v51 }
  0x29   : > { %v741_v13 = vor.u32 %v740_v25, %v737_v18  ;;  %v754_v14 = vshll.u32 %v2762_v60, 16  ;;  %v765_v62 = vor.u32 %v764_v22, %v761_v45  ;;  %v799_v25 = vor.u32 %v2713_v16, %v2711_v11 }
  0x2a   : > { %v802_v18 = vshll.u32 %v2782_v63, 16  ;;  %v684_v0 = vrot.slane %v682_v32, 5  ;;  %v708_v6 = vrot.slane %v706_v55, 5  ;;  %v3495_v63 = vshrl.u32 %v2588_v23, 16 }
  0x2b   : > { %2234 = vmatmul.mubr.msk.bf16.vlgmr.msra.gmra.mxu0 %vm299_vm3, %v2642_v46  ;;  %v742_v16 = vrot.slane %v741_v13, 4  ;;  %v766_v32 = vrot.slane %v765_v62, 4  ;;  %v1339_v62 = vrot.slane %v2748_v50, 5 }
  0x2c   : > { %2268 = vmatpush3.bf16.msra.mxu0 %v2602_v30  ;;  %2237 = vmatprep.mubr.msk.bf16.mxu0 %vm299_vm3, %v2670_v58  ;;  %v768_v30 = vshll.u32 %v2645_v47, 16  ;;  %v809_v9 = vrot.slane %v3495_v63, 4 }
  0x2d   : > { %2216 = vmatmul.mubr.msk.bf16.vlgmr.msra.gmra.mxu1 %vm299_vm3, %v2548_v7  ;;  %2366 = vmatprep.subr.msk.bf16.mxu0 %vm324_vm0, %v2651_v48  ;;  %v730_v7 = vshll.u32 %v2753_v27, 16  ;;  %v751_v48 = vor.u32 %v750_v36, %v2764_v35  ;;  %v778_v36 = vshll.u32 %v2791_v44, 16 }
  0x2e   : > { %2250 = vmatpush3.bf16.msra.mxu1 %v2595_v26  ;;  %2219 = vmatprep.mubr.msk.bf16.mxu1 %vm299_vm3, %v2599_v29  ;;  %v770_v17 = vrot.slane %v768_v30, 5  ;;  %v789_v26 = vor.u32 %v2697_v3, %v2695_v2  ;;  %v670_v2 = vrot.slane %v669_v40, 4  ;;  %v680_v3 = vrot.slane %v679_v57, 4 }
  0x2f   : > { %2365 = vmatprep.subr.msk.bf16.mxu1 %vm324_vm0, %v2634_v43  ;;  %v732_v45 = vrot.slane %v730_v7, 5  ;;  %v756_v30 = vrot.slane %v754_v14, 5  ;;  %v752_v41 = vrot.slane %v751_v48, 4  ;;  %v804_v29 = vrot.slane %v802_v18, 5 }
  0x30   : > { %v775_v43 = vor.u32 %v774_v15, %v770_v17  ;;  %v790_v55 = vrot.slane %v789_v26, 4  ;;  %v800_v15 = vrot.slane %v799_v25, 4  ;;  %v3496_v40 = vshll.u32 %v2588_v23, 16 }
  0x31   : > { %v699_v7 = vsel %vm2807_vm7, %v2703_v10, %v2604_v31  ;;  %v780_v14 = vrot.slane %v778_v36, 5  ;;  %v816_v48 = vshll.u32 %v2591_v24, 16  ;;  %v675_v63 = vsel %vm2807_vm7, %v670_v2, %v2750_v51 }
  0x32   : > { %v812_v57 = vrot.slane %v3496_v40, 5  ;;  %v776_v13 = vrot.slane %v775_v43, 4  ;;  %v723_v31 = vsel %vm2807_vm7, %v2734_v49, %v2679_v61  ;;  %v685_v10 = vsel %vm2807_vm7, %v680_v3, %v684_v0 }
  0x33   : > { %2238 = vmatmul.mubr.msk.bf16.gmra.mxu0 %vm299_vm3, %v2560_v12  ;;  %v747_v51 = vsel %vm2807_vm7, %v742_v16, %v2764_v35  ;;  %v771_v50 = vsel %vm2807_vm7, %v766_v32, %v770_v17  ;;  %v795_v61 = vsel %vm2807_vm7, %v790_v55, %v2711_v11  ;;  %v805_v0 = vsel %vm2807_vm7, %v800_v15, %v804_v29  ;;  %v2894_v15 = vld [vmem:[%s2538_s7 + $0x5c] sm:$0x1] }
  0x34   : > { %2241 = vmatprep.mubr.msk.bf16.mxu0 %vm299_vm3, %v2618_v37  ;;  %v813_v49 = vor.u32 %v812_v57, %v809_v9  ;;  %v2861_v35 = vrot.slane %v816_v48, 5  ;;  %v3497_v26 = vshrl.u32 %v2591_v24, 16  ;;  %v840_v25 = vshll.u32 %v2624_v39, 16 }
  0x35   : > { %2220 = vmatmul.mubr.msk.bf16.gmra.mxu1 %vm299_vm3, %v2642_v46  ;;  %v709_v46 = vsel %vm2807_vm7, %v2709_v5, %v708_v6  ;;  %v757_v6 = vsel %vm2807_vm7, %v752_v41, %v756_v30  ;;  %v2850_v5 = vld [vmem:[%s2538_s7 + $0x50] sm:$0x1]  ;;  %v1172_v17 = vshll.u32 %v2759_v59, 16  ;;  %v3498_v11 = vshrl.u32 %v2621_v38, 16 }
  0x36   : > { %2223 = vmatprep.mubr.msk.bf16.mxu1 %vm299_vm3, %v2670_v58  ;;  %v733_v58 = vsel %vm2807_vm7, %v2739_v56, %v732_v45  ;;  %v781_v56 = vsel %vm2807_vm7, %v776_v13, %v780_v14  ;;  %v822_v41 = vrot.slane %v3497_v26, 4  ;;  %v826_v18 = vshll.u32 %v2850_v5, 16 }
  0x37   : > { %v2870_v43 = vrot.slane %v3498_v11, 4  ;;  %v3499_v9 = vshll.u32 %v2621_v38, 16  ;;  %v1182_v36 = vshrl.u32 %v2772_v28, 16  ;;  %v2026_v2 = vcombine.low %v675_v63, %v685_v10  ;;  %v3504_v11 = vld [vmem:[#allocation3_spill] sm:$0xff] }
  0x38   : > { %v2879_v3 = vcombine.low %v699_v7, %v709_v46  ;;  %v2881_v45 = vcombine.low %v723_v31, %v733_v58  ;;  %v2885_v30 = vcombine.low %v747_v51, %v757_v6  ;;  %v2887_v16 = vcombine.low %v771_v50, %v781_v56 }
  0x39   : > { %v2874_v29 = vrot.slane %v3499_v9, 5  ;;  %v2889_v32 = vcombine.low %v795_v61, %v805_v0  ;;  %v2891_v55 = vrot.slane %v813_v49, 4  ;;  %v823_v40 = vor.u32 %v822_v41, %v2861_v35 }
  0x3a   : > { %v2899_v57 = vrot.slane %v840_v25, 5  ;;  %v3500_v7 = vshrl.u32 %v2624_v39, 16  ;;  %v1340_v13 = vsel %vm2550_vm4, %v2693_v1, %v1339_v62  ;;  %v2910_v14 = vrot.slane %v826_v18, 5 }
  0x3b   : > { %2242 = vmatmul.mubr.msk.bf16.gmra.mxu0 %vm299_vm3, %v2657_v52  ;;  %v1030_v48 = vshll.u32 %v2663_v54, 16  ;;  %v2916_v63 = vcombine.low %v2576_v19, %v1340_v13  ;;  %v850_v46 = vshll.u32 %v2894_v15, 16  ;;  %v3501_v31 = vshrl.u32 %v2660_v53, 16 }
  0x3c   : > { %2245 = vmatprep.mubr.msk.bf16.mxu0 %vm299_vm3, %v2701_v4  ;;  %v2903_v4 = vrot.slane %v3500_v7, 4  ;;  %v2064_v1 = vrot.slane %v2581_v20, 9  ;;  %v3502_v62 = vshll.u32 %v2660_v53, 16  ;;  %v1346_v51 = vrot.slane %v2753_v27, 5 }
  0x3d   : > { %2224 = vmatmul.mubr.msk.bf16.gmra.mxu1 %vm299_vm3, %v2560_v12  ;;  %v837_v12 = vor.u32 %v2874_v29, %v2870_v43  ;;  %v2921_v10 = vrot.slane %v3501_v31, 4  ;;  %v2065_v6 = vrot.slane %v2607_v33, 9  ;;  %v1350_v19 = vrot.slane %v2610_v34, 5 }
  0x3e   : > { %2227 = vmatprep.mubr.msk.bf16.mxu1 %vm299_vm3, %v2618_v37  ;;  %v1343_v37 = vrot.slane %v2584_v21, 5  ;;  %v2927_v58 = vrot.slane %v3502_v62, 5  ;;  %v2932_v50 = vrot.slane %v823_v40, 4  ;;  %v847_v61 = vor.u32 %v2903_v4, %v2899_v57  ;;  %v3506_v40 = vld [vmem:[#allocation2_spill] sm:$0xff] }
  0x3f   : > { %v2938_v21 = vrot.slane %v1030_v48, 5  ;;  %v1351_v49 = vsel %vm2550_vm4, %v2065_v6, %v1350_v19  ;;  %v1352_v56 = vrot.slane %v1350_v19, 4  ;;  %v1353_v27 = vrot.slane %v2762_v60, 5  ;;  %v255_v19 = vld [vmem:[%s2538_s7 + $0x74] sm:$0x1] }
  0x40   : > { %v1344_v20 = vsel %vm2550_vm4, %v2064_v1, %v1343_v37  ;;  %v1345_v0 = vrot.slane %v1343_v37, 4  ;;  %v3503_v33 = vcombine.low %v2759_v59, %v2772_v28  ;;  %v2066_v26 = vrot.slane %v2629_v42, 9  ;;  %v3509_v1 = vld [vmem:[#allocation9_spill] sm:$0xff] }
  0x41   : > { %v1357_v41 = vrot.slane %v2645_v47, 5  ;;  %v1360_v25 = vrot.slane %v2791_v44, 5  ;;  %v1354_v60 = vsel %vm2550_vm4, %v1352_v56, %v1353_v27  ;;  %v3505_v9 = vrot.slane %v3504_v11, 5 }
  0x42   : > { %v1347_v34 = vsel %vm2550_vm4, %v1345_v0, %v1346_v51  ;;  %v3507_v7 = vrot.slane %v3506_v40, 9  ;;  %v2968_v44 = vcombine.low %v1351_v49, %v1354_v60  ;;  %v1367_v37 = vrot.slane %v3509_v1, 5 }
  0x43   : > { %2246 = vmatmul.mubr.msk.bf16.gmra.mxu0 %vm299_vm3, %v3503_v33  ;;  %v2954_v18 = vcombine.low %v1344_v20, %v1347_v34  ;;  %v3508_v47 = vmov %v3505_v9  ;;  %v1358_v48 = vsel %vm2550_vm4, %v2066_v26, %v1357_v41  ;;  %v1359_v31 = vrot.slane %v1357_v41, 4 }
  0x44   : > { %2269 = vmatprep.mubr.msk.bf16.mxu0 %vm299_vm3, %v2879_v3  ;;  %v1365_v42 = vsel %vm2550_vm4, %v3507_v7, %v3505_v9  ;;  %v1366_v13 = vrot.slane %v3508_v47, 4  ;;  %v2068_v62 = vrot.slane %v2588_v23, 9  ;;  %v1371_v51 = vrot.slane %v2591_v24, 5 }
  0x45   : > { %2228 = vmatmul.mubr.msk.bf16.gmra.mxu1 %vm299_vm3, %v2657_v52  ;;  %v1374_v6 = vrot.slane %v2850_v5, 5  ;;  %v3510_v20 = vshrl.u32 %v2759_v59, 16  ;;  %v1361_v0 = vsel %vm2550_vm4, %v1359_v31, %v1360_v25  ;;  %v1174_v56 = vrot.slane %v1172_v17, 5  ;;  %v2998_v17 = vld [vmem:[%s3472_s1 + $0x10] sm:$0x3] }
  0x46   : > { %2251 = vmatprep.mubr.msk.bf16.mxu1 %vm299_vm3, %v2026_v2  ;;  %v1368_v49 = vsel %vm2550_vm4, %v1366_v13, %v1367_v37  ;;  %v1178_v2 = vshll.u32 %v2772_v28, 16  ;;  %v2987_v23 = vcombine.low %v1358_v48, %v1361_v0  ;;  %v1372_v5 = vsel %vm2550_vm4, %v2068_v62, %v1371_v51  ;;  %v3511_v13 = vld [vmem:[#allocation7_spill] sm:$0xff] }
  0x47   : > { %v1171_v52 = vrot.slane %v3510_v20, 4  ;;  %v2989_v24 = vcombine.low %v1365_v42, %v1368_v49  ;;  %v1373_v27 = vrot.slane %v1371_v51, 4  ;;  %v1184_v26 = vrot.slane %v1182_v36, 4  ;;  %v3010_v36 = vld [vmem:[%s3472_s1 + $0xa] sm:$0x3]  ;;  %v3512_v20 = vld [vmem:[#allocation6_spill] sm:$0xff] }
  0x48   : > { %v1180_v34 = vrot.slane %v1178_v2, 5  ;;  %v1188_v41 = vshll.u32 %v255_v19, 16  ;;  %v2069_v60 = vrot.slane %v2621_v38, 9  ;;  %v1378_v11 = vrot.slane %v2624_v39, 5  ;;  %v252_v38 = vld [vmem:[%s2538_s7 + $0x68] sm:$0x1] }
  0x49   : > { %v1175_v33 = vor.u32 %v1174_v56, %v1171_v52  ;;  %v1375_v25 = vsel %vm2550_vm4, %v1373_v27, %v1374_v6  ;;  %v1381_v9 = vrot.slane %v2894_v15, 5  ;;  %v2087_v31 = vrot.slane %v2660_v53, 9 }
  0x4a   : > { %v3012_v40 = vcombine.low %v1372_v5, %v1375_v25  ;;  %v1185_v42 = vor.u32 %v1184_v26, %v1180_v34  ;;  %v1190_v47 = vrot.slane %v1188_v41, 5  ;;  %v1379_v39 = vsel %vm2550_vm4, %v2069_v60, %v1378_v11 }
  0x4b   : > { %2270 = vmatmul.mubr.msk.bf16.vlgmr.msra.gmra.mxu0 %vm299_vm3, %v2881_v45  ;;  %v1176_v7 = vrot.slane %v1175_v33, 4  ;;  %v1380_v48 = vrot.slane %v1378_v11, 4  ;;  %v1552_v1 = vrot.slane %v2663_v54, 5  ;;  %v1555_v51 = vrot.slane %v252_v38, 5 }
  0x4c   : > { %2304 = vmatpush3.bf16.msra.mxu0 %v3511_v13  ;;  %2273 = vmatprep.mubr.msk.bf16.mxu0 %vm299_vm3, %v2885_v30  ;;  %v1186_v62 = vrot.slane %v1185_v42, 4  ;;  %v2098_v6 = vrot.slane %v2759_v59, 9  ;;  %v1684_v0 = vrot.slane %v2772_v28, 5  ;;  %v3513_v49 = vshrl.u32 %v2663_v54, 16 }
  0x4d   : > { %2252 = vmatmul.mubr.msk.bf16.vlgmr.msra.gmra.mxu1 %vm299_vm3, %v2879_v3  ;;  %2368 = vmatprep.subr.msk.bf16.mxu0 %vm324_vm0, %v2998_v17  ;;  %v1181_v37 = vsel %vm2807_vm7, %v1176_v7, %v1180_v34  ;;  %v1382_v53 = vsel %vm2550_vm4, %v1380_v48, %v1381_v9  ;;  %v1553_v3 = vsel %vm2550_vm4, %v2087_v31, %v1552_v1  ;;  %v1554_v52 = vrot.slane %v1552_v1, 4  ;;  %v3515_v9 = vld [vmem:[#allocation4_spill] sm:$0xff] }
  0x4e   : > { %2286 = vmatpush3.bf16.msra.mxu1 %v3512_v20  ;;  %2255 = vmatprep.mubr.msk.bf16.mxu1 %vm299_vm3, %v2881_v45  ;;  %v1036_v56 = vrot.slane %v3513_v49, 4  ;;  %v1191_v59 = vsel %vm2807_vm7, %v1186_v62, %v1190_v47  ;;  %v3043_v2 = vcombine.low %v1379_v39, %v1382_v53  ;;  %v1687_v5 = vrot.slane %v255_v19, 5  ;;  %v3516_v47 = vld [vmem:[#allocation8_spill] sm:$0xff] }
  0x4f   : > { %2367 = vmatprep.subr.msk.bf16.mxu1 %vm324_vm0, %v3010_v36  ;;  %v2053_v27 = vcombine.low %v1181_v37, %v1191_v59  ;;  %v1556_v33 = vsel %vm2550_vm4, %v1554_v52, %v1555_v51  ;;  %v3049_v34 = vsel %vm2550_vm4, %v2098_v6, %v1684_v0  ;;  %v1686_v28 = vrot.slane %v1684_v0, 4 }
  0x50   : > { %v838_v54 = vrot.slane %v837_v12, 4  ;;  %v848_v26 = vrot.slane %v847_v61, 4  ;;  %v852_v19 = vrot.slane %v850_v46, 5  ;;  %v3059_v41 = vcombine.low %v1553_v3, %v1556_v33  ;;  %v3514_v61 = vld [vmem:[#allocation5_spill] sm:$0xff] }
  0x51   : > { %v3063_v25 = vsel %vm2550_vm4, %v1686_v28, %v1687_v5  ;;  %v819_v43 = vsel %vm2807_vm7, %v2891_v55, %v2861_v35  ;;  %v829_v15 = vsel %vm2807_vm7, %v2932_v50, %v2910_v14  ;;  %v1027_v4 = vor.u32 %v2927_v58, %v2921_v10 }
  0x52   : > { %v2100_v29 = vcombine.low %v3049_v34, %v3063_v25  ;;  %v1037_v12 = vor.u32 %v1036_v56, %v2938_v21  ;;  %v1040_v46 = vshll.u32 %v252_v38, 16  ;;  %v843_v35 = vsel %vm2807_vm7, %v838_v54, %v2899_v57 }
  0x53   : > { %2274 = vmatmul.mubr.msk.bf16.gmra.mxu0 %vm299_vm3, %v2887_v16  ;;  %v853_v55 = vsel %vm2807_vm7, %v848_v26, %v852_v19  ;;  %v1329_v60 = vrot.slane %v3514_v61, 5  ;;  %v2032_v14 = vcombine.low %v819_v43, %v829_v15  ;;  %v1028_v58 = vrot.slane %v1027_v4, 4 }
  0x54   : > { %2277 = vmatprep.mubr.msk.bf16.mxu0 %vm299_vm3, %v2889_v32  ;;  %v2033_v10 = vcombine.low %v843_v35, %v853_v55  ;;  %v1038_v50 = vrot.slane %v1037_v12, 4  ;;  %v1042_v11 = vrot.slane %v1040_v46, 5  ;;  %v2062_v7 = vrot.slane %v3515_v9, 9 }
  0x55   : > { %2256 = vmatmul.mubr.msk.bf16.gmra.mxu1 %vm299_vm3, %v2885_v30  ;;  %v1331_v42 = vrot.slane %v1329_v60, 4  ;;  %v1332_v13 = vrot.slane %v3516_v47, 5  ;;  %v1033_v57 = vsel %vm2807_vm7, %v1028_v58, %v2938_v21  ;;  %v1698_v22 = vsel %vm324_vm0, %v2998_v17, 0 }
  0x56   : > { %2259 = vmatprep.mubr.msk.bf16.mxu1 %vm299_vm3, %v2887_v16  ;;  %v1043_v38 = vsel %vm2807_vm7, %v1038_v50, %v1042_v11  ;;  %v1330_v39 = vsel %vm2550_vm4, %v2062_v7, %v1329_v60  ;;  %v1566_v8 = vsel %vm324_vm0, %v3010_v36, 0 }
  0x57   : > { %v1333_v48 = vsel %vm2550_vm4, %v1331_v42, %v1332_v13  ;;  %v2043_v31 = vcombine.low %v1033_v57, %v1043_v38 }
  0x58   : > { %v2071_v1 = vcombine.low %v1330_v39, %v1333_v48 }
  0x5b   : > { %2278 = vmatmul.mubr.msk.bf16.gmra.mxu0 %vm299_vm3, %v2032_v14 }
  0x5c   : > { %2281 = vmatprep.mubr.msk.bf16.mxu0 %vm299_vm3, %v2033_v10 }
  0x5d   : > { %2260 = vmatmul.mubr.msk.bf16.gmra.mxu1 %vm299_vm3, %v2889_v32 }
  0x5e   : > { %2263 = vmatprep.mubr.msk.bf16.mxu1 %vm299_vm3, %v2032_v14 }
  0x63   : > { %2282 = vmatmul.mubr.msk.bf16.gmra.mxu0 %vm299_vm3, %v2043_v31 }
  0x64   : > { %2305 = vmatprep.mubr.msk.bf16.mxu0 %vm299_vm3, %v2071_v1 }
  0x65   : > { %2264 = vmatmul.mubr.msk.bf16.gmra.mxu1 %vm299_vm3, %v2033_v10 }
  0x66   : > { %2287 = vmatprep.mubr.msk.bf16.mxu1 %vm299_vm3, %v2881_v45 }
  0x6b   : > { %2306 = vmatmul.mubr.msk.bf16.vlgmr.msra.gmra.mxu0 %vm299_vm3, %v2916_v63 }
  0x6c   : > { %2340 = vmatpush3.bf16.msra.mxu0 %v1698_v22  ;;  %2309 = vmatprep.mubr.msk.bf16.mxu0 %vm299_vm3, %v2954_v18 }
  0x6d   : > { %2288 = vmatmul.mubr.msk.bf16.vlgmr.msra.gmra.mxu1 %vm299_vm3, %v2885_v30 }
  0x6e   : > { %2322 = vmatpush3.bf16.msra.mxu1 %v1566_v8  ;;  %2291 = vmatprep.mubr.msk.bf16.mxu1 %vm299_vm3, %v2887_v16 }
  0x73   : > { %2310 = vmatmul.mubr.msk.bf16.gmra.mxu0 %vm299_vm3, %v2968_v44 }
  0x74   : > { %2313 = vmatprep.mubr.msk.bf16.mxu0 %vm299_vm3, %v2987_v23 }
  0x75   : > { %2292 = vmatmul.mubr.msk.bf16.gmra.mxu1 %vm299_vm3, %v2889_v32 }
  0x76   : > { %2295 = vmatprep.mubr.msk.bf16.mxu1 %vm299_vm3, %v2032_v14 }
  0x7b   : > { %2314 = vmatmul.mubr.msk.bf16.gmra.mxu0 %vm299_vm3, %v2989_v24 }
  0x7c   : > { %2317 = vmatprep.mubr.msk.bf16.mxu0 %vm299_vm3, %v3012_v40 }
  0x7d   : > { %2296 = vmatmul.mubr.msk.bf16.gmra.mxu1 %vm299_vm3, %v2033_v10 }
  0x7e   : > { %2299 = vmatprep.mubr.msk.bf16.mxu1 %vm299_vm3, %v2043_v31 }
  0x83   : > { %2318 = vmatmul.mubr.msk.bf16.gmra.mxu0 %vm299_vm3, %v3043_v2 }
  0x84   : > { %2341 = vmatprep.mubr.msk.bf16.mxu0 %vm299_vm3, %v2954_v18 }
  0x85   : > { %2300 = vmatmul.mubr.msk.bf16.gmra.mxu1 %vm299_vm3, %v2053_v27 }
  0x86   : > { %2323 = vmatprep.mubr.msk.bf16.mxu1 %vm299_vm3, %v2916_v63 }
  0x8b   : > { %2342 = vmatmul.mubr.msk.bf16.vlgmr.msra.gmra.mxu0 %vm299_vm3, %v2968_v44 }
  0x8c   : > { %2345 = vmatprep.mubr.msk.bf16.mxu0 %vm299_vm3, %v2987_v23 }
  0x8d   : > { %2324 = vmatmul.mubr.msk.bf16.vlgmr.msra.gmra.mxu1 %vm299_vm3, %v2954_v18 }
  0x8e   : > { %2327 = vmatprep.mubr.msk.bf16.mxu1 %vm299_vm3, %v2968_v44 }
  0x93   : > { %2346 = vmatmul.mubr.msk.bf16.gmra.mxu0 %vm299_vm3, %v2989_v24 }
  0x94   : > { %2349 = vmatprep.mubr.msk.bf16.mxu0 %vm299_vm3, %v3012_v40 }
  0x95   : > { %2328 = vmatmul.mubr.msk.bf16.gmra.mxu1 %vm299_vm3, %v2987_v23 }
  0x96   : > { %2331 = vmatprep.mubr.msk.bf16.mxu1 %vm299_vm3, %v2989_v24 }
  0x9b   : > { %2350 = vmatmul.mubr.msk.bf16.gmra.mxu0 %vm299_vm3, %v3043_v2 }
  0x9c   : > { %2353 = vmatprep.mubr.msk.bf16.mxu0 %vm299_vm3, %v3059_v41 }
  0x9d   : > { %2332 = vmatmul.mubr.msk.bf16.gmra.mxu1 %vm299_vm3, %v3012_v40 }
  0x9e   : > { %2335 = vmatprep.mubr.msk.bf16.mxu1 %vm299_vm3, %v3043_v2 }
  0xa3   : > { %2354 = vmatmul.mubr.msk.bf16.gmra.mxu0 %vm299_vm3, %v2100_v29 }
  0xa5   : > { %2336 = vmatmul.mubr.msk.bf16.gmra.mxu1 %vm299_vm3, %v3059_v41 }
  0xdb   : > { %v2199_v45 = vpop.f32.mrf.mxu0 }
  0xdc   : > { %v2207_v30 = vpop.f32.mrf.mxu1 }
  0xdd   : > { %v362_v16 = vpop.f32.mrf.mxu0 }
  0xde   : > { %v394_v32 = vpop.f32.mrf.mxu1 }
  0xdf   : > { %v2200_v63 = vpop.f32.mrf.mxu0 }
  0xe0   : > { %v2208_v21 = vpop.f32.mrf.mxu1 }
  0xe1   : > { %v365_v18 = vpop.f32.mrf.mxu0 }
  0xe2   : > { %v397_v44 = vpop.f32.mrf.mxu1 }
  0xe3   : > { %v2203_v23 = vpop.f32.mrf.mxu0 }
  0xe4   : > { %v2211_v24 = vpop.f32.mrf.mxu1 }
  0xe5   : > { %v378_v17 = vpop.f32.mrf.mxu0 }
  0xe6   : > { %v410_v36 = vpop.f32.mrf.mxu1 }
  0xe7   : > { %v2204_v40 = vpop.f32.mrf.mxu0 }
  0xe8   : > { %v2212_v37 = vpop.f32.mrf.mxu1 }
  0xe9   : > { %v381_v62 = vpop.f32.mrf.mxu0 }
  0xea   : > { %v3175_v51 = vpop.f32.mrf.mxu1 }
  0xeb   : > { %v2235_v6 = vpop.f32.mrf.mxu0 }
  0xed   : > { %v2217_v20 = vpop.f32.mrf.mxu1  ;;  %v580_v53 = vpop.f32.mrf.mxu0 }
  0xee   : > { %v479_v3 = vadd.f32 %v2217_v20, %v2199_v45 }
  0xef   : > { %v470_v52 = vpop.f32.mrf.mxu1  ;;  %v2236_v0 = vpop.f32.mrf.mxu0 }
  0xf0   : > { %v3177_v49 = vadd.f32 %v2235_v6, %v479_v3  ;;  %v471_v56 = vadd.f32 %v470_v52, %v362_v16 }
  0xf1   : > { %v2218_v59 = vpop.f32.mrf.mxu1  ;;  %v583_v2 = vpop.f32.mrf.mxu0 }
  0xf2   : > { %v3179_v5 = vadd.f32 %v580_v53, %v471_v56  ;;  %v482_v27 = vadd.f32 %v2218_v59, %v2200_v63 }
  0xf3   : > { %v473_v33 = vpop.f32.mrf.mxu1  ;;  %v2239_v34 = vpop.f32.mrf.mxu0 }
  0xf4   : > { %v3181_v28 = vadd.f32 %v2236_v0, %v482_v27  ;;  %v474_v54 = vadd.f32 %v473_v33, %v365_v18 }
  0xf5   : > { %v2221_v26 = vpop.f32.mrf.mxu1  ;;  %v596_v19 = vpop.f32.mrf.mxu0 }
  0xf6   : > { %v3183_v41 = vadd.f32 %v583_v2, %v474_v54  ;;  %v495_v25 = vadd.f32 %v2221_v26, %v2203_v23 }
  0xf7   : > { %v486_v43 = vpop.f32.mrf.mxu1  ;;  %v2240_v29 = vpop.f32.mrf.mxu0 }
  0xf8   : > { %v3185_v15 = vadd.f32 %v2239_v34, %v495_v25  ;;  %v487_v4 = vadd.f32 %v486_v43, %v378_v17 }
  0xf9   : > { %v2222_v12 = vpop.f32.mrf.mxu1  ;;  %v599_v46 = vpop.f32.mrf.mxu0 }
  0xfa   : > { %v3187_v35 = vadd.f32 %v596_v19, %v487_v4  ;;  %v498_v55 = vadd.f32 %v2222_v12, %v2204_v40 }
  0xfb   : > { %v489_v61 = vpop.f32.mrf.mxu1  ;;  %v2243_v60 = vpop.f32.mrf.mxu0 }
  0xfc   : > { %v3189_v14 = vadd.f32 %v2240_v29, %v498_v55  ;;  %v490_v10 = vadd.f32 %v489_v61, %v381_v62 }
  0xfd   : > { %v2225_v58 = vpop.f32.mrf.mxu1  ;;  %v612_v50 = vpop.f32.mrf.mxu0 }
  0xfe   : > { %v3191_v11 = vadd.f32 %v599_v46, %v490_v10  ;;  %v511_v9 = vadd.f32 %v2225_v58, %v2207_v30 }
  0xff   : > { %v502_v7 = vpop.f32.mrf.mxu1  ;;  %v2244_v42 = vpop.f32.mrf.mxu0 }
 0x100   : > { %v3193_v47 = vadd.f32 %v2243_v60, %v511_v9  ;;  %v503_v13 = vadd.f32 %v502_v7, %v394_v32 }
 0x101   : > { %v2226_v57 = vpop.f32.mrf.mxu1  ;;  %v615_v38 = vpop.f32.mrf.mxu0 }
 0x102   : > { %v3195_v39 = vadd.f32 %v612_v50, %v503_v13  ;;  %v514_v48 = vadd.f32 %v2226_v57, %v2208_v21 }
 0x103   : > { %v505_v31 = vpop.f32.mrf.mxu1  ;;  %v2247_v1 = vpop.f32.mrf.mxu0 }
 0x104   : > { %v3197_v22 = vadd.f32 %v2244_v42, %v514_v48  ;;  %v506_v8 = vadd.f32 %v505_v31, %v397_v44 }
 0x105   : > { %v2229_v45 = vpop.f32.mrf.mxu1  ;;  %v628_v16 = vpop.f32.mrf.mxu0 }
 0x106   : > { %v3199_v63 = vadd.f32 %v615_v38, %v506_v8  ;;  %v527_v30 = vadd.f32 %v2229_v45, %v2211_v24 }
 0x107   : > { %v518_v18 = vpop.f32.mrf.mxu1  ;;  %v2248_v23 = vpop.f32.mrf.mxu0 }
 0x108   : > { %v3201_v17 = vadd.f32 %v2247_v1, %v527_v30  ;;  %v519_v32 = vadd.f32 %v518_v18, %v410_v36 }
 0x109   : > { %v2230_v40 = vpop.f32.mrf.mxu1  ;;  %v631_v62 = vpop.f32.mrf.mxu0 }
 0x10a   : > { %v3203_v6 = vadd.f32 %v628_v16, %v519_v32  ;;  %v530_v21 = vadd.f32 %v2230_v40, %v2212_v37 }
 0x10b   : > { %v521_v20 = vpop.f32.mrf.mxu1  ;;  %v3205_v53 = vpop.f32.mrf.mxu0 }
 0x10c   : > { %v3207_v3 = vadd.f32 %v2248_v23, %v530_v21  ;;  %v522_v44 = vadd.f32 %v521_v20, %v3175_v51 }
 0x10d   : > { %v2253_v52 = vpop.f32.mrf.mxu1  ;;  %v3210_v0 = vpop.f32.mrf.mxu0 }
 0x10e   : > { %3517 = vst [vmem:[#allocation3_spill] sm:$0xff] %v3207_v3  ;;  %v3212_v24 = vadd.f32 %v631_v62, %v522_v44 }
 0x10f   : > { %v941_v56 = vpop.f32.mrf.mxu1  ;;  %v3214_v59 = vpop.f32.mrf.mxu0 }
 0x110   : > { %3518 = vst [vmem:[#allocation2_spill] sm:$0xff] %v3212_v24 }
 0x111   : > { %v2254_v36 = vpop.f32.mrf.mxu1  ;;  %v3216_v2 = vpop.f32.mrf.mxu0 }
 0x113   : > { %v944_v27 = vpop.f32.mrf.mxu1  ;;  %v3218_v37 = vpop.f32.mrf.mxu0 }
 0x115   : > { %v3220_v33 = vpop.f32.mrf.mxu1  ;;  %v3222_v34 = vpop.f32.mrf.mxu0 }
 0x117   : > { %v3224_v54 = vpop.f32.mrf.mxu1  ;;  %v3226_v51 = vpop.f32.mrf.mxu0 }
 0x119   : > { %v3228_v26 = vpop.f32.mrf.mxu1  ;;  %v3230_v19 = vpop.f32.mrf.mxu0 }
 0x11b   : > { %v3232_v25 = vpop.f32.mrf.mxu1  ;;  %v3234_v43 = vpop.f32.mrf.mxu0 }
 0x11d   : > { %v3236_v29 = vpop.f32.mrf.mxu1  ;;  %v3238_v4 = vpop.f32.mrf.mxu0 }
 0x11f   : > { %v3240_v12 = vpop.f32.mrf.mxu1  ;;  %v3242_v46 = vpop.f32.mrf.mxu0 }
 0x121   : > { %v3244_v55 = vpop.f32.mrf.mxu1  ;;  %v3246_v61 = vpop.f32.mrf.mxu0 }
 0x123   : > { %v3248_v60 = vpop.f32.mrf.mxu1  ;;  %v3250_v10 = vpop.f32.mrf.mxu0 }
 0x124   : > { %3519 = vst [vmem:[#allocation9_spill] sm:$0xff] %v3250_v10  ;;  %v1006_v10 = vadd.f32 %v2253_v52, %v3177_v49  ;;  %v1005_v52 = vadd.f32 %v944_v27, %v3183_v41  ;;  %v1009_v27 = vadd.f32 %v3232_v25, %v3191_v11  ;;  %v1015_v25 = vadd.f32 %v3244_v55, %v3197_v22 }
 0x125   : > { %v3252_v58 = vpop.f32.mrf.mxu1  ;;  %v3254_v50 = vpop.f32.mrf.mxu0 }
 0x126   : > { %3520 = vst [vmem:[#allocation7_spill] sm:$0xff] %v3254_v50 }
 0x127   : > { %v3256_v9 = vpop.f32.mrf.mxu1  ;;  %v3258_v7 = vpop.f32.mrf.mxu0 }
 0x128   : > { %3521 = vst [vmem:[#allocation6_spill] sm:$0xff] %v3258_v7 }
 0x129   : > { %v3260_v42 = vpop.f32.mrf.mxu1  ;;  %v3262_v13 = vpop.f32.mrf.mxu0 }
 0x12a   : > { %3522 = vst [vmem:[#allocation5_spill] sm:$0xff] %v3260_v42  ;;  %3523 = vst [vmem:[#allocation4_spill] sm:$0xff] %v3262_v13 }
 0x12b   : > { %v3264_v57 = vpop.f32.mrf.mxu1  ;;  %v2307_v38 = vpop.f32.mrf.mxu0 }
 0x12c   : > { %3524 = vst [vmem:[#allocation8_spill] sm:$0xff] %v3264_v57 }
 0x12d   : > { %v2289_v48 = vpop.f32.mrf.mxu1  ;;  %v1470_v31 = vpop.f32.mrf.mxu0 }
 0x12f   : > { %v1237_v1 = vpop.f32.mrf.mxu1  ;;  %v3266_v8 = vpop.f32.mrf.mxu0 }
 0x131   : > { %v2290_v45 = vpop.f32.mrf.mxu1  ;;  %v3268_v16 = vpop.f32.mrf.mxu0 }
 0x133   : > { %v1240_v30 = vpop.f32.mrf.mxu1  ;;  %v3270_v18 = vpop.f32.mrf.mxu0 }
 0x135   : > { %v3272_v23 = vpop.f32.mrf.mxu1  ;;  %v3274_v32 = vpop.f32.mrf.mxu0 }
 0x137   : > { %v3276_v40 = vpop.f32.mrf.mxu1  ;;  %v3278_v62 = vpop.f32.mrf.mxu0 }
 0x138   : > { %3525 = vst [vmem:[#allocation10_spill] sm:$0xff] %v3278_v62 }
 0x139   : > { %v3280_v21 = vpop.f32.mrf.mxu1  ;;  %v3282_v20 = vpop.f32.mrf.mxu0 }
 0x13a   : > { %3526 = vst [vmem:[#allocation11_spill] sm:$0xff] %v3282_v20 }
 0x13b   : > { %v3284_v44 = vpop.f32.mrf.mxu1  ;;  %v3286_v13 = vpop.f32.mrf.mxu0 }
 0x13c   : > { %3527 = vst [vmem:[#allocation12_spill] sm:$0xff] %v3286_v13  ;;  %v1004_v13 = vadd.f32 %v941_v56, %v3179_v5 }
 0x13d   : > { %v3288_v7 = vpop.f32.mrf.mxu1  ;;  %v3290_v57 = vpop.f32.mrf.mxu0 }
 0x13e   : > { %3528 = vst [vmem:[#allocation13_spill] sm:$0xff] %v3288_v7  ;;  %3529 = vst [vmem:[#allocation14_spill] sm:$0xff] %v3290_v57  ;;  %v1152_v49 = vadd.f32 %v3210_v0, %v1004_v13  ;;  %v1011_v0 = vadd.f32 %v3228_v26, %v3189_v14 }
 0x13f   : > { %v3292_v24 = vpop.f32.mrf.mxu1  ;;  %v3294_v42 = vpop.f32.mrf.mxu0 }
 0x140   : > { %3530 = vst [vmem:[#allocation15_spill] sm:$0xff] %v3292_v24  ;;  %3531 = vst [vmem:[#allocation16_spill] sm:$0xff] %v3294_v42  ;;  %v1154_v24 = vadd.f32 %v3205_v53, %v1006_v10  ;;  %v1007_v42 = vadd.f32 %v2254_v36, %v3181_v28  ;;  %v1300_v53 = vadd.f32 %v1237_v1, %v1152_v49 }
 0x141   : > { %v3296_v3 = vpop.f32.mrf.mxu1  ;;  %v3298_v50 = vpop.f32.mrf.mxu0  ;;  %v1010_v28 = vadd.f32 %v3220_v33, %v3185_v15  ;;  %v1008_v36 = vadd.f32 %v3224_v54, %v3187_v35  ;;  %v1014_v15 = vadd.f32 %v3236_v29, %v3193_v47  ;;  %v1012_v35 = vadd.f32 %v3240_v12, %v3195_v39  ;;  %v3350_v47 = vld [vmem:[%s3473_s2] ss:$0 sm:$0xff] }
 0x142   : > { %3532 = vst [vmem:[#allocation17_spill] sm:$0xff] %v3296_v3  ;;  %3533 = vst [vmem:[#allocation18_spill] sm:$0xff] %v3298_v50  ;;  %v1302_v5 = vadd.f32 %v2289_v48, %v1154_v24  ;;  %v1153_v24 = vadd.f32 %v3216_v2, %v1005_v52  ;;  %v1533_v54 = vadd.f32 %v1470_v31, %v1300_v53  ;;  %v3361_v31 = vld [vmem:[%s3474_s3] ss:$0 sm:$0xff] }
 0x143   : > { %v3301_v62 = vpop.f32.mrf.mxu1  ;;  %v3303_v20 = vpop.f32.mrf.mxu0  ;;  %v1158_v48 = vadd.f32 %v3218_v37, %v1010_v28  ;;  %v1156_v2 = vadd.f32 %v3222_v34, %v1008_v36  ;;  %v1159_v11 = vadd.f32 %v3226_v51, %v1011_v0  ;;  %v1157_v12 = vadd.f32 %v3230_v19, %v1009_v27 }
 0x144   : > { %3534 = vst [vmem:[#allocation19_spill] sm:$0xff] %v3303_v20  ;;  %v1301_v26 = vadd.f32 %v1240_v30, %v1153_v24  ;;  %v1162_v51 = vadd.f32 %v3234_v43, %v1014_v15  ;;  %v1160_v22 = vadd.f32 %v3238_v4, %v1012_v35  ;;  %v1163_v4 = vadd.f32 %v3242_v46, %v1015_v25 }
 0x145   : > { %v3307_v7 = vpop.f32.mrf.mxu1  ;;  %v3309_v57 = vpop.f32.mrf.mxu0  ;;  %v1306_v55 = vadd.f32 %v3272_v23, %v1158_v48  ;;  %v1013_v23 = vadd.f32 %v3248_v60, %v3199_v63  ;;  %v1307_v49 = vadd.f32 %v3280_v21, %v1159_v11  ;;  %v1016_v0 = vadd.f32 %v3256_v9, %v3203_v6  ;;  %v3537_v27 = vld [vmem:[#allocation13_spill] sm:$0xff]  ;;  %v3539_v48 = vld [vmem:[#allocation7_spill] sm:$0xff] }
 0x146   : > { %3535 = vst [vmem:[#allocation20_spill] sm:$0xff] %v3309_v57  ;;  %v1155_v57 = vadd.f32 %v3214_v59, %v1007_v42  ;;  %v1535_v59 = vadd.f32 %v2307_v38, %v1302_v5  ;;  %v1304_v38 = vadd.f32 %v3276_v40, %v1156_v2  ;;  %v1534_v19 = vadd.f32 %v3268_v16, %v1301_v26  ;;  %v3538_v26 = vld [vmem:[#allocation9_spill] sm:$0xff] }
 0x147   : > { %v3313_v3 = vpop.f32.mrf.mxu1  ;;  %v3315_v50 = vpop.f32.mrf.mxu0  ;;  %v1018_v40 = vadd.f32 %v3252_v58, %v3201_v17  ;;  %v1539_v46 = vadd.f32 %v3270_v18, %v1306_v55  ;;  %v1305_v60 = vadd.f32 %v3284_v44, %v1157_v12  ;;  %v1161_v9 = vadd.f32 %v3246_v61, %v1013_v23  ;;  %v3536_v18 = vld [vmem:[#allocation10_spill] sm:$0xff]  ;;  %v3540_v61 = vld [vmem:[#allocation11_spill] sm:$0xff] }
 0x148   : > { %v1303_v42 = vadd.f32 %v2290_v45, %v1155_v57  ;;  %v1537_v63 = vadd.f32 %v3274_v32, %v1304_v38  ;;  %v1540_v32 = vadd.f32 %v3536_v18, %v1307_v49  ;;  %v1310_v44 = vadd.f32 %v3537_v27, %v1162_v51  ;;  %v3541_v51 = vld [vmem:[#allocation12_spill] sm:$0xff]  ;;  %v3542_v38 = vld [vmem:[#allocation15_spill] sm:$0xff] }
 0x149   : > { %v3319_v56 = vpop.f32.mrf.mxu1  ;;  %v3321_v20 = vpop.f32.mrf.mxu0  ;;  %v1164_v2 = vadd.f32 %v3539_v48, %v1016_v0  ;;  %v1538_v11 = vadd.f32 %v3540_v61, %v1305_v60 }
 0x14a   : > { %v1536_v37 = vadd.f32 %v3266_v8, %v1303_v42  ;;  %v1543_v55 = vadd.f32 %v3541_v51, %v1310_v44 }
 0x14b   : > { %v3330_v10 = vpop.f32.mrf.mxu1  ;;  %v2343_v41 = vpop.f32.mrf.mxu0 }
 0x14d   : > { %v2325_v33 = vpop.f32.mrf.mxu1  ;;  %v1734_v14 = vpop.f32.mrf.mxu0 }
 0x14e   : > { %v1667_v13 = vadd.f32 %v2325_v33, %v1535_v59 }
 0x14f   : > { %v1602_v39 = vpop.f32.mrf.mxu1  ;;  %v2344_v29 = vpop.f32.mrf.mxu0 }
 0x150   : > { %v1799_v34 = vadd.f32 %v2343_v41, %v1667_v13  ;;  %v1665_v57 = vadd.f32 %v1602_v39, %v1533_v54  ;;  %v1166_v13 = vadd.f32 %v3538_v26, %v1018_v40 }
 0x151   : > { %v2326_v1 = vpop.f32.mrf.mxu1  ;;  %v1737_v45 = vpop.f32.mrf.mxu0 }
 0x152   : > { %v1822_v8 = vmul.f32 %v3350_v47, %v1799_v34  ;;  %v1797_v30 = vadd.f32 %v1734_v14, %v1665_v57  ;;  %v1668_v43 = vadd.f32 %v2326_v1, %v1536_v37  ;;  %v1308_v1 = vadd.f32 %v3542_v38, %v1160_v22 }
 0x153   : > { %v1605_v52 = vpop.f32.mrf.mxu1  ;;  %v2347_v5 = vpop.f32.mrf.mxu0  ;;  %v1309_v22 = vadd.f32 %v3301_v62, %v1161_v9 }
 0x154   : > { %v1845_v53 = vadd.f32 %v3361_v31, %v1822_v8  ;;  %v1820_v16 = vmul.f32 %v3350_v47, %v1797_v30  ;;  %v1800_v28 = vadd.f32 %v2344_v29, %v1668_v43  ;;  %v1666_v36 = vadd.f32 %v1605_v52, %v1534_v19 }
 0x155   : > { %v2329_v17 = vpop.f32.mrf.mxu1  ;;  %v1750_v58 = vpop.f32.mrf.mxu0 }
 0x156   : > { %v1861_v21 = vmax.f32 %v1845_v53, 0.0  ;;  %v1843_v41 = vadd.f32 %v3361_v31, %v1820_v16  ;;  %v1823_v24 = vmul.f32 %v3350_v47, %v1800_v28  ;;  %v1798_v6 = vadd.f32 %v1737_v45, %v1666_v36  ;;  %v3543_v45 = vld [vmem:[#allocation17_spill] sm:$0xff]  ;;  %v3546_v28 = vld [vmem:[#allocation2_spill] sm:$0xff]  ;;  %v3547_v36 = vld [vmem:[#allocation8_spill] sm:$0xff] }
 0x157   : > { %v1671_v59 = vadd.f32 %v2329_v17, %v1539_v46  ;;  %v1618_v42 = vpop.f32.mrf.mxu1  ;;  %v2348_v15 = vpop.f32.mrf.mxu0  ;;  %v1311_v19 = vadd.f32 %v3543_v45, %v1163_v4  ;;  %v3545_v53 = vld [vmem:[#allocation5_spill] sm:$0xff]  ;;  %v1017_v0 = vadd.f32 %v3547_v36, %v3546_v28  ;;  %v3554_v45 = vld [vmem:[#allocation20_spill] sm:$0xff] }
 0x158   : > { %1877 = vst [vmem:[%s3382_s9 + $0x10] sm:$0xff] %v1861_v21  ;;  %v1859_v35 = vmax.f32 %v1843_v41, 0.0  ;;  %v1846_v33 = vadd.f32 %v3361_v31, %v1823_v24  ;;  %v1821_v14 = vmul.f32 %v3350_v47, %v1798_v6  ;;  %v1669_v54 = vadd.f32 %v1618_v42, %v1537_v63  ;;  %v3548_v41 = vld [vmem:[#allocation14_spill] sm:$0xff]  ;;  %v3549_v6 = vld [vmem:[#allocation16_spill] sm:$0xff] }
 0x159   : > { %v1803_v25 = vadd.f32 %v2347_v5, %v1671_v59  ;;  %v2330_v39 = vpop.f32.mrf.mxu1  ;;  %v1753_v29 = vpop.f32.mrf.mxu0  ;;  %v3544_v5 = vld [vmem:[#allocation3_spill] sm:$0xff]  ;;  %v1541_v24 = vadd.f32 %v3548_v41, %v1308_v1  ;;  %v1544_v18 = vadd.f32 %v3549_v6, %v1311_v19 }
 0x15a   : > { %1875 = vst [vmem:[%s3382_s9] sm:$0xff] %v1859_v35  ;;  %v1862_v12 = vmax.f32 %v1846_v33, 0.0  ;;  %v1844_v37 = vadd.f32 %v3361_v31, %v1821_v14  ;;  %v1801_v34 = vadd.f32 %v1750_v58, %v1669_v54  ;;  %v1672_v57 = vadd.f32 %v2330_v39, %v1540_v32  ;;  %v3550_v35 = vld [vmem:[#allocation18_spill] sm:$0xff] }
 0x15b   : > { %v1826_v8 = vmul.f32 %v3350_v47, %v1803_v25  ;;  %v1621_v30 = vpop.f32.mrf.mxu1  ;;  %v2351_v43 = vpop.f32.mrf.mxu0  ;;  %v1019_v16 = vadd.f32 %v3545_v53, %v3544_v5  ;;  %v1314_v32 = vadd.f32 %v3307_v7, %v1166_v13  ;;  %v1542_v33 = vadd.f32 %v3550_v35, %v1309_v22  ;;  %v3551_v25 = vld [vmem:[#allocation6_spill] sm:$0xff] }
 0x15c   : > { %1878 = vst [vmem:[%s3382_s9 + $0x18] sm:$0xff] %v1862_v12  ;;  %v1860_v23 = vmax.f32 %v1844_v37, 0.0  ;;  %v1824_v40 = vmul.f32 %v3350_v47, %v1801_v34  ;;  %v1804_v49 = vadd.f32 %v2348_v15, %v1672_v57  ;;  %v1670_v52 = vadd.f32 %v1621_v30, %v1538_v11  ;;  %v3553_v37 = vld [vmem:[#allocation19_spill] sm:$0xff] }
 0x15d   : > { %v1849_v4 = vadd.f32 %v3361_v31, %v1826_v8  ;;  %v2333_v46 = vpop.f32.mrf.mxu1  ;;  %v1766_v63 = vpop.f32.mrf.mxu0  ;;  %v1312_v14 = vadd.f32 %v3313_v3, %v1164_v2  ;;  %v1167_v39 = vadd.f32 %v3551_v25, %v1019_v16  ;;  %v1547_v34 = vadd.f32 %v3553_v37, %v1314_v32 }
 0x15e   : > { %1876 = vst [vmem:[%s3382_s9 + $0x8] sm:$0xff] %v1860_v23  ;;  %v1847_v60 = vadd.f32 %v3361_v31, %v1824_v40  ;;  %v1827_v17 = vmul.f32 %v3350_v47, %v1804_v49  ;;  %v1802_v58 = vadd.f32 %v1753_v29, %v1670_v52  ;;  %v1675_v21 = vadd.f32 %v2333_v46, %v1543_v55  ;;  %v3552_v29 = vld [vmem:[#allocation4_spill] sm:$0xff] }
 0x15f   : > { %v1865_v62 = vmax.f32 %v1849_v4, 0.0  ;;  %v1634_v9 = vpop.f32.mrf.mxu1  ;;  %v2352_v27 = vpop.f32.mrf.mxu0  ;;  %v1165_v12 = vadd.f32 %v3552_v29, %v1017_v0  ;;  %v1545_v19 = vadd.f32 %v3554_v45, %v1312_v14  ;;  %v1315_v8 = vadd.f32 %v3319_v56, %v1167_v39 }
 0x160   : > { %v1863_v44 = vmax.f32 %v1847_v60, 0.0  ;;  %v1850_v59 = vadd.f32 %v3361_v31, %v1827_v17  ;;  %v1825_v42 = vmul.f32 %v3350_v47, %v1802_v58  ;;  %v1807_v15 = vadd.f32 %v2351_v43, %v1675_v21 }
 0x161   : > { %1881 = vst [vmem:[%s3382_s9 + $0x30] sm:$0xff] %v1865_v62  ;;  %v1673_v54 = vadd.f32 %v1634_v9, %v1541_v24  ;;  %v2334_v26 = vpop.f32.mrf.mxu1  ;;  %v1769_v48 = vpop.f32.mrf.mxu0  ;;  %v1313_v30 = vadd.f32 %v3330_v10, %v1165_v12  ;;  %v1548_v22 = vadd.f32 %v3315_v50, %v1315_v8 }
 0x162   : > { %1879 = vst [vmem:[%s3382_s9 + $0x20] sm:$0xff] %v1863_v44  ;;  %v1866_v7 = vmax.f32 %v1850_v59, 0.0  ;;  %v1848_v13 = vadd.f32 %v3361_v31, %v1825_v42  ;;  %v1830_v61 = vmul.f32 %v3350_v47, %v1807_v15  ;;  %v1676_v11 = vadd.f32 %v2334_v26, %v1544_v18 }
 0x163   : > { %v1805_v3 = vadd.f32 %v1766_v63, %v1673_v54  ;;  %v1637_v2 = vpop.f32.mrf.mxu1  ;;  %v2355_v57 = vpop.f32.mrf.mxu0  ;;  %v1546_v4 = vadd.f32 %v3321_v20, %v1313_v30 }
 0x164   : > { %1882 = vst [vmem:[%s3382_s9 + $0x38] sm:$0xff] %v1866_v7  ;;  %v1864_v51 = vmax.f32 %v1848_v13, 0.0  ;;  %v1853_v55 = vadd.f32 %v3361_v31, %v1830_v61  ;;  %v1808_v38 = vadd.f32 %v2352_v27, %v1676_v11  ;;  %v1674_v1 = vadd.f32 %v1637_v2, %v1542_v33 }
 0x165   : > { %v1828_v43 = vmul.f32 %v3350_v47, %v1805_v3  ;;  %v2337_v23 = vpop.f32.mrf.mxu1  ;;  %v1782_v40 = vpop.f32.mrf.mxu0 }
 0x166   : > { %1880 = vst [vmem:[%s3382_s9 + $0x28] sm:$0xff] %v1864_v51  ;;  %v1869_v49 = vmax.f32 %v1853_v55, 0.0  ;;  %v1831_v52 = vmul.f32 %v3350_v47, %v1808_v38  ;;  %v1806_v5 = vadd.f32 %v1769_v48, %v1674_v1  ;;  %v1679_v53 = vadd.f32 %v2337_v23, %v1547_v34 }
 0x167   : > { %v1851_v16 = vadd.f32 %v3361_v31, %v1828_v43  ;;  %v1650_v28 = vpop.f32.mrf.mxu1  ;;  %v2356_v60 = vpop.f32.mrf.mxu0 }
 0x168   : > { %1885 = vst [vmem:[%s3382_s9 + $0x50] sm:$0xff] %v1869_v49  ;;  %v1854_v36 = vadd.f32 %v3361_v31, %v1831_v52  ;;  %v1829_v56 = vmul.f32 %v3350_v47, %v1806_v5  ;;  %v1811_v10 = vadd.f32 %v2355_v57, %v1679_v53  ;;  %v1677_v0 = vadd.f32 %v1650_v28, %v1545_v19 }
 0x169   : > { %v1867_v46 = vmax.f32 %v1851_v16, 0.0  ;;  %v2338_v63 = vpop.f32.mrf.mxu1  ;;  %v1785_v9 = vpop.f32.mrf.mxu0 }
 0x16a   : > { %v1870_v17 = vmax.f32 %v1854_v36, 0.0  ;;  %v1852_v58 = vadd.f32 %v3361_v31, %v1829_v56  ;;  %v1834_v21 = vmul.f32 %v3350_v47, %v1811_v10  ;;  %v1809_v41 = vadd.f32 %v1782_v40, %v1677_v0 }
 0x16b   : > { %1883 = vst [vmem:[%s3382_s9 + $0x40] sm:$0xff] %v1867_v46  ;;  %v1680_v24 = vadd.f32 %v2338_v63, %v1548_v22  ;;  %v1653_v6 = vpop.f32.mrf.mxu1 }
 0x16c   : > { %1886 = vst [vmem:[%s3382_s9 + $0x58] sm:$0xff] %v1870_v17  ;;  %v1868_v18 = vmax.f32 %v1852_v58, 0.0  ;;  %v1857_v50 = vadd.f32 %v3361_v31, %v1834_v21  ;;  %v1832_v20 = vmul.f32 %v3350_v47, %v1809_v41  ;;  %v1678_v32 = vadd.f32 %v1653_v6, %v1546_v4 }
 0x16d   : > { %v1812_v62 = vadd.f32 %v2356_v60, %v1680_v24 }
 0x16e   : > { %1884 = vst [vmem:[%s3382_s9 + $0x48] sm:$0xff] %v1868_v18  ;;  %v1873_v27 = vmax.f32 %v1857_v50, 0.0  ;;  %v1855_v44 = vadd.f32 %v3361_v31, %v1832_v20  ;;  %v1810_v59 = vadd.f32 %v1785_v9, %v1678_v32 }
 0x16f   : > { %v1835_v42 = vmul.f32 %v3350_v47, %v1812_v62 }
 0x170   : > { %1889 = vst [vmem:[%s3382_s9 + $0x70] sm:$0xff] %v1873_v27  ;;  %v1871_v15 = vmax.f32 %v1855_v44, 0.0  ;;  %v1833_v35 = vmul.f32 %v3350_v47, %v1810_v59 }
 0x171   : > { %v1858_v33 = vadd.f32 %v3361_v31, %v1835_v42 }
 0x172   : > { %1887 = vst [vmem:[%s3382_s9 + $0x60] sm:$0xff] %v1871_v15  ;;  %v1856_v14 = vadd.f32 %v3361_v31, %v1833_v35 }
 0x173   : > { %v1874_v54 = vmax.f32 %v1858_v33, 0.0 }
 0x174   : > { %v1872_v26 = vmax.f32 %v1856_v14, 0.0 }
 0x175   : > { %1890 = vst [vmem:[%s3382_s9 + $0x78] sm:$0xff] %v1874_v54 }
 0x176   : > { %1888 = vst [vmem:[%s3382_s9 + $0x68] sm:$0xff] %v1872_v26 }
 0x177 PF: > { %s14_s19 = sadd.s32 1, %s2458_s19   ;;  %s3555_s15 = smov %s2450_s17 }
 0x178   : > { %p11_p7 = scmp.ge.s32.totalorder %s14_s19, 6   ;;  %s3556_s16 = smov %s2454_s18 }
 0x179   : > { %s3557_s17 = smov %s3560_s20  ;;  %s3558_s18 = smov %s3564_s21 }
 0x17a   :  { %13 = sbr.rel (!%p11_p7) target bundleno = 3 (0x3), region = 75 }

</bundles_post_ra>
